<compile_context>
chip_gen: v7x
topology: tpu7x:2x2x1
jax: 0.10.0
libtpu: 0.0.40
codegen_flags: <defaults>
</compile_context>

<pallas_src>
import jax
import jax.numpy as jnp
from jax import lax
from jax.experimental import pallas as pl
from jax.experimental.pallas import tpu as pltpu


# ----------------------------- fused Pallas kernel -------------------------- #

def _bilstm_crf_kernel(x_ref, wih_ref, b_ref, whh_ref,
                       wtag_ref, btag_ref, start_ref, end_ref, trans_ref,
                       logits_ref, preds_ref):
    """Fused BiLSTM + Linear + CRF Viterbi decode (mask=None, all steps valid).

    Gate column layout per direction is [i | f | o | g], each H wide (wrapper reorders
    PyTorch's i|f|g|o so the sigmoid gates are contiguous).

    x_ref:      (T*B, E)  f32  time-major embeddings, row index = t*B + b
    wih_ref:    (E, 8H)   f32  [Wih_fwd.T | Wih_bwd.T]
    b_ref:      (1, 8H)   f32  [(b_ih+b_hh)_fwd | (b_ih+b_hh)_bwd]
    whh_ref:    (2H, 8H)  f32  block-diag [[Whh_fwd.T, 0], [0, Whh_bwd.T]]
    wtag_ref:   (2H, NT)  f32  hidden2tag weight.T
    btag_ref:   (1, NT)   f32
    start_ref:  (1, NT)   f32  CRF start transitions
    end_ref:    (1, NT)   f32  CRF end transitions
    trans_ref:  (NT, NT)  f32  trans[j, k] = score of transition j -> k
    logits_ref: (T*B, NT) f32  emissions (output), row index = t*B + b
    preds_ref:  (B, T)    i32  Viterbi best tag sequence (output)
    """
    B, T = preds_ref.shape
    H2 = whh_ref.shape[0]
    H = H2 // 2
    NT = trans_ref.shape[0]
    H3, H4, H8 = 3 * H, 4 * H, 8 * H

    # ---- 1) hoisted input projection for both directions (one MXU matmul), as a value ----
    gx = (jnp.dot(x_ref[...], wih_ref[...], preferred_element_type=jnp.float32)
          + b_ref[...])                                    # (T*B, 8H)
    gx_steps = [gx[s * B:(s + 1) * B, :] for s in range(T)]   # static slices, stay in vregs

    # ---- 2) fused bidirectional recurrence: ONE block-diag MXU issue per timestep ----
    whh = whh_ref[...]
    h = jnp.zeros((B, H2), jnp.float32)                    # [h_f | h_b]
    c_f = jnp.zeros((B, H), jnp.float32)
    c_b = jnp.zeros((B, H), jnp.float32)
    hf_list = [None] * T
    hb_list = [None] * T

    def gate_math(gates, c):
        # gates: (B, 4H) with column layout i|f|o|g
        sio = jax.nn.sigmoid(gates[:, 0:H3])               # i|f|o in one EUP call
        i_, f_, o_ = sio[:, 0:H], sio[:, H:2 * H], sio[:, 2 * H:H3]
        g_ = jnp.tanh(gates[:, H3:H4])
        c = f_ * c + i_ * g_
        hh = o_ * jnp.tanh(c)
        return hh, c

    for s in range(T):                                     # static unroll (T compile-time)
        r = T - 1 - s                                      # backward direction's time index
        g = jnp.dot(h, whh, preferred_element_type=jnp.float32)   # (B, 8H), one matmul
        h_f, c_f = gate_math(g[:, 0:H4] + gx_steps[s][:, 0:H4], c_f)
        h_b, c_b = gate_math(g[:, H4:H8] + gx_steps[r][:, H4:H8], c_b)
        hf_list[s] = h_f
        hb_list[r] = h_b
        h = jnp.concatenate([h_f, h_b], axis=1)

    # ---- 3) tag projection over all timesteps (one MXU matmul); emissions kept as value ----
    hseq = jnp.concatenate(
        [jnp.concatenate([hf_list[t], hb_list[t]], axis=1) for t in range(T)], axis=0)
    em = (jnp.dot(hseq, wtag_ref[...], preferred_element_type=jnp.float32)
          + btag_ref[...])                                 # (T*B, NT)
    logits_ref[...] = em                                   # single store; Viterbi reads `em`

    # ---- 4) CRF Viterbi decode (mask=None), vectorized over previous tags ----
    trans = trans_ref[...]
    prev_iota = lax.broadcasted_iota(jnp.int32, (B, NT, NT), 1)
    score = start_ref[...] + em[0:B, :]                    # (B, NT)
    hist = []                                              # backpointers kept as values
    for t in range(1, T):
        ns = score[:, :, None] + trans[None, :, :]         # (B, prev NT, cur NT)
        mx = jnp.max(ns, axis=1)                           # (B, NT)  cross-sublane reduce
        bp = jnp.min(jnp.where(ns == mx[:, None, :], prev_iota, NT), axis=1)  # first argmax
        hist.append(bp)
        score = mx + em[t * B:(t + 1) * B, :]

    final = score + end_ref[...]                           # (B, NT)
    lane_iota = lax.broadcasted_iota(jnp.int32, (B, NT), 1)
    fmax = jnp.max(final, axis=1, keepdims=True)           # (B, 1)
    cur = jnp.min(jnp.where(final == fmax, lane_iota, NT), axis=1, keepdims=True)  # (B, 1)

    time_iota = lax.broadcasted_iota(jnp.int32, (B, T), 1)
    path = jnp.zeros((B, T), jnp.int32)
    for t in range(T - 1, -1, -1):                         # backtrace, unrolled
        path = jnp.where(time_iota == t, cur, path)
        if t > 0:
            onehot = lane_iota == cur
            cur = jnp.sum(jnp.where(onehot, hist[t - 1], 0), axis=1, keepdims=True)
    preds_ref[...] = path


# ----------------------------- wrapper --------------------------------------- #

def _vmem():
    return pl.BlockSpec(memory_space=pltpu.MemorySpace.VMEM)


def _reorder_gates(w, H):
    """Reorder PyTorch gate blocks i|f|g|o -> i|f|o|g along axis 0."""
    return jnp.concatenate([w[0:2 * H], w[3 * H:4 * H], w[2 * H:3 * H]], axis=0)


@jax.jit
def bilstm_crf_forward(words, params):
    """Returns (predicted tag ids (B, T) int32, logits (B, T, NT) f32)."""
    B, T = words.shape
    H = params["w_hh_f"].shape[1]
    NT = params["w_tag"].shape[0]

    # embedding lookup directly in time-major flattened order (row = t*B + b)
    # TODO(synk): at production sizes, scalar-prefetch `ids` and gather embedding rows
    #             inside the pipeline instead of materializing x_flat in HBM first.
    ids = jnp.transpose(words, (1, 0)).reshape(T * B)
    x_flat = jnp.take(params["embedding"], ids, axis=0).astype(jnp.float32)   # (T*B, E)

    # weight prep (tiny, traced once per call): gate reorder, transpose to (in, out),
    # concat both directions' input projections, fold ih+hh biases, build block-diag Whh.
    wih_f = _reorder_gates(params["w_ih_f"], H)            # (4H, E)
    wih_b = _reorder_gates(params["w_ih_b"], H)
    whh_f = _reorder_gates(params["w_hh_f"], H)            # (4H, H)
    whh_b = _reorder_gates(params["w_hh_b"], H)
    b_f = _reorder_gates(params["b_ih_f"] + params["b_hh_f"], H)
    b_b = _reorder_gates(params["b_ih_b"] + params["b_hh_b"], H)

    wih_cat = jnp.concatenate([wih_f.T, wih_b.T], axis=1)          # (E, 8H)
    b_cat = jnp.concatenate([b_f, b_b]).reshape(1, 8 * H)          # (1, 8H)

    z = jnp.zeros((H, 4 * H), jnp.float32)
    whh_blk = jnp.concatenate(
        [jnp.concatenate([whh_f.T, z], axis=1),
         jnp.concatenate([z, whh_b.T], axis=1)], axis=0)           # (2H, 8H)

    logits_flat, preds = pl.pallas_call(
        _bilstm_crf_kernel,
        out_shape=(jax.ShapeDtypeStruct((T * B, NT), jnp.float32),
                   jax.ShapeDtypeStruct((B, T), jnp.int32)),
        in_specs=[_vmem()] * 9,
        out_specs=(_vmem(), _vmem()),
    )(x_flat, wih_cat, b_cat, whh_blk,
      params["w_tag"].T, params["b_tag"].reshape(1, NT),
      params["crf_start"].reshape(1, NT), params["crf_end"].reshape(1, NT),
      params["crf_trans"])

    logits = jnp.transpose(logits_flat.reshape(T, B, NT), (1, 0, 2))   # (B, T, NT)
    return preds, logits


# ----------------------------- params ---------------------------------------- #

def init_params(key, vocab_size, tagset_size, embedding_dim, hidden_dim):
    E, H, NT = embedding_dim, hidden_dim, tagset_size
    ks = jax.random.split(key, 14)
    k_lstm = 1.0 / float(H) ** 0.5
    k_lin = 1.0 / float(2 * H) ** 0.5
    u = lambda kk, shape, lim: jax.random.uniform(kk, shape, jnp.float32, -lim, lim)
    return dict(
        embedding=jax.random.normal(ks[0], (vocab_size, E), jnp.float32),
        w_ih_f=u(ks[1], (4 * H, E), k_lstm), w_hh_f=u(ks[2], (4 * H, H), k_lstm),
        b_ih_f=u(ks[3], (4 * H,), k_lstm),   b_hh_f=u(ks[4], (4 * H,), k_lstm),
        w_ih_b=u(ks[5], (4 * H, E), k_lstm), w_hh_b=u(ks[6], (4 * H, H), k_lstm),
        b_ih_b=u(ks[7], (4 * H,), k_lstm),   b_hh_b=u(ks[8], (4 * H,), k_lstm),
        w_tag=u(ks[9], (NT, 2 * H), k_lin),  b_tag=u(ks[10], (NT,), k_lin),
        crf_start=u(ks[11], (NT,), 0.1),
        crf_end=u(ks[12], (NT,), 0.1),
        crf_trans=u(ks[13], (NT, NT), 0.1),
    )


# ----------------------------- pure-JAX reference --------------------------- #

def _ref_lstm(x_tbe, wih_t, whh_t, bias):
    H = whh_t.shape[0]
    B = x_tbe.shape[1]

    def step(carry, x_t):
        h, c = carry
        gates = x_t @ wih_t + h @ whh_t + bias
        i = jax.nn.sigmoid(gates[:, :H])
        f = jax.nn.sigmoid(gates[:, H:2 * H])
        g = jnp.tanh(gates[:, 2 * H:3 * H])
        o = jax.nn.sigmoid(gates[:, 3 * H:])
        c = f * c + i * g
        h = o * jnp.tanh(c)
        return (h, c), h

    init = (jnp.zeros((B, H), jnp.float32), jnp.zeros((B, H), jnp.float32))
    _, hs = lax.scan(step, init, x_tbe)
    return hs


def _ref_logits(words, params):
    H = params["w_hh_f"].shape[1]
    emb = jnp.take(params["embedding"], words, axis=0)
    x = jnp.transpose(emb, (1, 0, 2)).astype(jnp.float32)
    hf = _ref_lstm(x, params["w_ih_f"].T, params["w_hh_f"].T,
                   (params["b_ih_f"] + params["b_hh_f"]).reshape(1, 4 * H))
    hb = _ref_lstm(x[::-1], params["w_ih_b"].T, params["w_hh_b"].T,
                   (params["b_ih_b"] + params["b_hh_b"]).reshape(1, 4 * H))[::-1]
    out = jnp.concatenate([hf, hb], axis=-1)
    logits = out @ params["w_tag"].T + params["b_tag"]
    return jnp.transpose(logits, (1, 0, 2))                       # (B, T, NT)


def _ref_viterbi(em_tbn, start, end, trans):
    T, B, _ = em_tbn.shape
    score = start[None, :] + em_tbn[0]
    history = []
    for t in range(1, T):
        ns = score[:, :, None] + trans[None, :, :]
        history.append(jnp.argmax(ns, axis=1))
        score = jnp.max(ns, axis=1) + em_tbn[t]
    score = score + end[None, :]
    cur = jnp.argmax(score, axis=1)
    tags = [cur]
    for idx in reversed(history):
        cur = idx[jnp.arange(B), cur]
        tags.append(cur)
    return jnp.stack(tags[::-1], axis=1).astype(jnp.int32)        # (B, T)


# ----------------------------- main ----------------------------------------- #

if __name__ == "__main__":
    VOCAB, NT, E, H = 50, 8, 32, 32
    B, T = 2, 8

    key = jax.random.PRNGKey(0)
    kp, kw = jax.random.split(key)
    params = init_params(kp, VOCAB, NT, E, H)
    words = jax.random.randint(kw, (B, T), 0, VOCAB, dtype=jnp.int32)

    preds, logits = bilstm_crf_forward(words, params)
    preds = jax.block_until_ready(preds)
    logits = jax.block_until_ready(logits)

    # correctness checks against pure-JAX reference.  Both kernel and reference run
    # matmuls at default (bf16-pass, f32-accumulate) TPU precision, so the tolerance is
    # slightly wider than an all-f32 comparison would need.
    ref_logits = _ref_logits(words, params)
    assert logits.shape == (B, T, NT)
    assert jnp.allclose(logits, ref_logits, atol=1e-2, rtol=1e-2), "logits mismatch"

    # Viterbi path must match exactly when decoded from the kernel's own emissions.
    ref_preds = _ref_viterbi(jnp.transpose(logits, (1, 0, 2)),
                             params["crf_start"], params["crf_end"],
                             params["crf_trans"])
    assert preds.shape == (B, T) and preds.dtype == jnp.int32
    assert jnp.array_equal(preds, ref_preds), "viterbi path mismatch"

    print("KERNEL_OK")
</pallas_src>

<mosaic_0001>
module attributes {stable_mosaic.version = 11 : i64} {
  func.func @_bilstm_crf_kernel(%arg0: memref<16x32xf32, #tpu.memory_space<vmem>>, %arg1: memref<32x256xf32, #tpu.memory_space<vmem>>, %arg2: memref<1x256xf32, #tpu.memory_space<vmem>>, %arg3: memref<64x256xf32, #tpu.memory_space<vmem>>, %arg4: memref<64x8xf32, #tpu.memory_space<vmem>>, %arg5: memref<1x8xf32, #tpu.memory_space<vmem>>, %arg6: memref<1x8xf32, #tpu.memory_space<vmem>>, %arg7: memref<1x8xf32, #tpu.memory_space<vmem>>, %arg8: memref<8x8xf32, #tpu.memory_space<vmem>>, %arg9: memref<16x8xf32, #tpu.memory_space<vmem>>, %arg10: memref<2x8xi32, #tpu.memory_space<vmem>>) attributes {dimension_semantics = [], scalar_prefetch = 0 : i64, scratch_operands = 0 : i64, tpu.core_type = #tpu.core_type<tc>} {
    %c0 = arith.constant 0 : index
    %c0_0 = arith.constant 0 : index
    %0 = vector.load %arg0[%c0, %c0_0] : memref<16x32xf32, #tpu.memory_space<vmem>>, vector<16x32xf32>
    %c0_1 = arith.constant 0 : index
    %c0_2 = arith.constant 0 : index
    %1 = vector.load %arg1[%c0_1, %c0_2] : memref<32x256xf32, #tpu.memory_space<vmem>>, vector<32x256xf32>
    %cst = arith.constant dense<0.000000e+00> : vector<16x256xf32>
    %2 = tpu.matmul %0, %1, %cst {dimension_numbers = #tpu.dot_dimension_numbers<[1], [0], [0], [1], [0, 0, 1, 1], [], []>} : vector<16x32xf32>, vector<32x256xf32>, vector<16x256xf32> -> vector<16x256xf32>
    %c0_3 = arith.constant 0 : index
    %c0_4 = arith.constant 0 : index
    %3 = vector.load %arg2[%c0_3, %c0_4] : memref<1x256xf32, #tpu.memory_space<vmem>>, vector<1x256xf32>
    %4 = vector.broadcast %3 : vector<1x256xf32> to vector<16x256xf32>
    %5 = arith.addf %2, %4 : vector<16x256xf32>
    %6 = vector.extract_strided_slice %5 {offsets = [0, 0], sizes = [2, 256], strides = [1, 1]} : vector<16x256xf32> to vector<2x256xf32>
    %7 = vector.extract_strided_slice %5 {offsets = [2, 0], sizes = [2, 256], strides = [1, 1]} : vector<16x256xf32> to vector<2x256xf32>
    %8 = vector.extract_strided_slice %5 {offsets = [4, 0], sizes = [2, 256], strides = [1, 1]} : vector<16x256xf32> to vector<2x256xf32>
    %9 = vector.extract_strided_slice %5 {offsets = [6, 0], sizes = [2, 256], strides = [1, 1]} : vector<16x256xf32> to vector<2x256xf32>
    %10 = vector.extract_strided_slice %5 {offsets = [8, 0], sizes = [2, 256], strides = [1, 1]} : vector<16x256xf32> to vector<2x256xf32>
    %11 = vector.extract_strided_slice %5 {offsets = [10, 0], sizes = [2, 256], strides = [1, 1]} : vector<16x256xf32> to vector<2x256xf32>
    %12 = vector.extract_strided_slice %5 {offsets = [12, 0], sizes = [2, 256], strides = [1, 1]} : vector<16x256xf32> to vector<2x256xf32>
    %13 = vector.extract_strided_slice %5 {offsets = [14, 0], sizes = [2, 256], strides = [1, 1]} : vector<16x256xf32> to vector<2x256xf32>
    %c0_5 = arith.constant 0 : index
    %c0_6 = arith.constant 0 : index
    %14 = vector.load %arg3[%c0_5, %c0_6] : memref<64x256xf32, #tpu.memory_space<vmem>>, vector<64x256xf32>
    %cst_7 = arith.constant 0.000000e+00 : f32
    %15 = vector.broadcast %cst_7 : f32 to vector<2x64xf32>
    %cst_8 = arith.constant 0.000000e+00 : f32
    %16 = vector.broadcast %cst_8 : f32 to vector<2x32xf32>
    %cst_9 = arith.constant 0.000000e+00 : f32
    %17 = vector.broadcast %cst_9 : f32 to vector<2x32xf32>
    %cst_10 = arith.constant dense<0.000000e+00> : vector<2x256xf32>
    %18 = tpu.matmul %15, %14, %cst_10 {dimension_numbers = #tpu.dot_dimension_numbers<[1], [0], [0], [1], [0, 0, 1, 1], [], []>} : vector<2x64xf32>, vector<64x256xf32>, vector<2x256xf32> -> vector<2x256xf32>
    %19 = vector.extract_strided_slice %18 {offsets = [0, 0], sizes = [2, 128], strides = [1, 1]} : vector<2x256xf32> to vector<2x128xf32>
    %20 = vector.extract_strided_slice %6 {offsets = [0, 0], sizes = [2, 128], strides = [1, 1]} : vector<2x256xf32> to vector<2x128xf32>
    %21 = arith.addf %19, %20 : vector<2x128xf32>
    %22 = vector.extract_strided_slice %21 {offsets = [0, 0], sizes = [2, 96], strides = [1, 1]} : vector<2x128xf32> to vector<2x96xf32>
    %23 = arith.negf %22 : vector<2x96xf32>
    %24 = math.exp %23 : vector<2x96xf32>
    %cst_11 = arith.constant 1.000000e+00 : f32
    %25 = vector.broadcast %cst_11 : f32 to vector<2x96xf32>
    %26 = arith.addf %25, %24 : vector<2x96xf32>
    %27 = arith.divf %25, %26 : vector<2x96xf32>
    %28 = vector.extract_strided_slice %27 {offsets = [0, 0], sizes = [2, 32], strides = [1, 1]} : vector<2x96xf32> to vector<2x32xf32>
    %29 = vector.extract_strided_slice %27 {offsets = [0, 32], sizes = [2, 32], strides = [1, 1]} : vector<2x96xf32> to vector<2x32xf32>
    %30 = vector.extract_strided_slice %27 {offsets = [0, 64], sizes = [2, 32], strides = [1, 1]} : vector<2x96xf32> to vector<2x32xf32>
    %31 = vector.extract_strided_slice %21 {offsets = [0, 96], sizes = [2, 32], strides = [1, 1]} : vector<2x128xf32> to vector<2x32xf32>
    %32 = math.tanh %31 : vector<2x32xf32>
    %33 = arith.mulf %29, %16 : vector<2x32xf32>
    %34 = arith.mulf %28, %32 : vector<2x32xf32>
    %35 = arith.addf %33, %34 : vector<2x32xf32>
    %36 = math.tanh %35 : vector<2x32xf32>
    %37 = arith.mulf %30, %36 : vector<2x32xf32>
    %38 = vector.extract_strided_slice %18 {offsets = [0, 128], sizes = [2, 128], strides = [1, 1]} : vector<2x256xf32> to vector<2x128xf32>
    %39 = vector.extract_strided_slice %13 {offsets = [0, 128], sizes = [2, 128], strides = [1, 1]} : vector<2x256xf32> to vector<2x128xf32>
    %40 = arith.addf %38, %39 : vector<2x128xf32>
    %41 = vector.extract_strided_slice %40 {offsets = [0, 0], sizes = [2, 96], strides = [1, 1]} : vector<2x128xf32> to vector<2x96xf32>
    %42 = arith.negf %41 : vector<2x96xf32>
    %43 = math.exp %42 : vector<2x96xf32>
    %cst_12 = arith.constant 1.000000e+00 : f32
    %44 = vector.broadcast %cst_12 : f32 to vector<2x96xf32>
    %45 = arith.addf %44, %43 : vector<2x96xf32>
    %46 = arith.divf %44, %45 : vector<2x96xf32>
    %47 = vector.extract_strided_slice %46 {offsets = [0, 0], sizes = [2, 32], strides = [1, 1]} : vector<2x96xf32> to vector<2x32xf32>
    %48 = vector.extract_strided_slice %46 {offsets = [0, 32], sizes = [2, 32], strides = [1, 1]} : vector<2x96xf32> to vector<2x32xf32>
    %49 = vector.extract_strided_slice %46 {offsets = [0, 64], sizes = [2, 32], strides = [1, 1]} : vector<2x96xf32> to vector<2x32xf32>
    %50 = vector.extract_strided_slice %40 {offsets = [0, 96], sizes = [2, 32], strides = [1, 1]} : vector<2x128xf32> to vector<2x32xf32>
    %51 = math.tanh %50 : vector<2x32xf32>
    %52 = arith.mulf %48, %17 : vector<2x32xf32>
    %53 = arith.mulf %47, %51 : vector<2x32xf32>
    %54 = arith.addf %52, %53 : vector<2x32xf32>
    %55 = math.tanh %54 : vector<2x32xf32>
    %56 = arith.mulf %49, %55 : vector<2x32xf32>
    %57 = tpu.concatenate %37, %56 in 1 : vector<2x32xf32>, vector<2x32xf32> -> vector<2x64xf32>
    %cst_13 = arith.constant dense<0.000000e+00> : vector<2x256xf32>
    %58 = tpu.matmul %57, %14, %cst_13 {dimension_numbers = #tpu.dot_dimension_numbers<[1], [0], [0], [1], [0, 0, 1, 1], [], []>} : vector<2x64xf32>, vector<64x256xf32>, vector<2x256xf32> -> vector<2x256xf32>
    %59 = vector.extract_strided_slice %58 {offsets = [0, 0], sizes = [2, 128], strides = [1, 1]} : vector<2x256xf32> to vector<2x128xf32>
    %60 = vector.extract_strided_slice %7 {offsets = [0, 0], sizes = [2, 128], strides = [1, 1]} : vector<2x256xf32> to vector<2x128xf32>
    %61 = arith.addf %59, %60 : vector<2x128xf32>
    %62 = vector.extract_strided_slice %61 {offsets = [0, 0], sizes = [2, 96], strides = [1, 1]} : vector<2x128xf32> to vector<2x96xf32>
    %63 = arith.negf %62 : vector<2x96xf32>
    %64 = math.exp %63 : vector<2x96xf32>
    %cst_14 = arith.constant 1.000000e+00 : f32
    %65 = vector.broadcast %cst_14 : f32 to vector<2x96xf32>
    %66 = arith.addf %65, %64 : vector<2x96xf32>
    %67 = arith.divf %65, %66 : vector<2x96xf32>
    %68 = vector.extract_strided_slice %67 {offsets = [0, 0], sizes = [2, 32], strides = [1, 1]} : vector<2x96xf32> to vector<2x32xf32>
    %69 = vector.extract_strided_slice %67 {offsets = [0, 32], sizes = [2, 32], strides = [1, 1]} : vector<2x96xf32> to vector<2x32xf32>
    %70 = vector.extract_strided_slice %67 {offsets = [0, 64], sizes = [2, 32], strides = [1, 1]} : vector<2x96xf32> to vector<2x32xf32>
    %71 = vector.extract_strided_slice %61 {offsets = [0, 96], sizes = [2, 32], strides = [1, 1]} : vector<2x128xf32> to vector<2x32xf32>
    %72 = math.tanh %71 : vector<2x32xf32>
    %73 = arith.mulf %69, %35 : vector<2x32xf32>
    %74 = arith.mulf %68, %72 : vector<2x32xf32>
    %75 = arith.addf %73, %74 : vector<2x32xf32>
    %76 = math.tanh %75 : vector<2x32xf32>
    %77 = arith.mulf %70, %76 : vector<2x32xf32>
    %78 = vector.extract_strided_slice %58 {offsets = [0, 128], sizes = [2, 128], strides = [1, 1]} : vector<2x256xf32> to vector<2x128xf32>
    %79 = vector.extract_strided_slice %12 {offsets = [0, 128], sizes = [2, 128], strides = [1, 1]} : vector<2x256xf32> to vector<2x128xf32>
    %80 = arith.addf %78, %79 : vector<2x128xf32>
    %81 = vector.extract_strided_slice %80 {offsets = [0, 0], sizes = [2, 96], strides = [1, 1]} : vector<2x128xf32> to vector<2x96xf32>
    %82 = arith.negf %81 : vector<2x96xf32>
    %83 = math.exp %82 : vector<2x96xf32>
    %cst_15 = arith.constant 1.000000e+00 : f32
    %84 = vector.broadcast %cst_15 : f32 to vector<2x96xf32>
    %85 = arith.addf %84, %83 : vector<2x96xf32>
    %86 = arith.divf %84, %85 : vector<2x96xf32>
    %87 = vector.extract_strided_slice %86 {offsets = [0, 0], sizes = [2, 32], strides = [1, 1]} : vector<2x96xf32> to vector<2x32xf32>
    %88 = vector.extract_strided_slice %86 {offsets = [0, 32], sizes = [2, 32], strides = [1, 1]} : vector<2x96xf32> to vector<2x32xf32>
    %89 = vector.extract_strided_slice %86 {offsets = [0, 64], sizes = [2, 32], strides = [1, 1]} : vector<2x96xf32> to vector<2x32xf32>
    %90 = vector.extract_strided_slice %80 {offsets = [0, 96], sizes = [2, 32], strides = [1, 1]} : vector<2x128xf32> to vector<2x32xf32>
    %91 = math.tanh %90 : vector<2x32xf32>
    %92 = arith.mulf %88, %54 : vector<2x32xf32>
    %93 = arith.mulf %87, %91 : vector<2x32xf32>
    %94 = arith.addf %92, %93 : vector<2x32xf32>
    %95 = math.tanh %94 : vector<2x32xf32>
    %96 = arith.mulf %89, %95 : vector<2x32xf32>
    %97 = tpu.concatenate %77, %96 in 1 : vector<2x32xf32>, vector<2x32xf32> -> vector<2x64xf32>
    %cst_16 = arith.constant dense<0.000000e+00> : vector<2x256xf32>
    %98 = tpu.matmul %97, %14, %cst_16 {dimension_numbers = #tpu.dot_dimension_numbers<[1], [0], [0], [1], [0, 0, 1, 1], [], []>} : vector<2x64xf32>, vector<64x256xf32>, vector<2x256xf32> -> vector<2x256xf32>
    %99 = vector.extract_strided_slice %98 {offsets = [0, 0], sizes = [2, 128], strides = [1, 1]} : vector<2x256xf32> to vector<2x128xf32>
    %100 = vector.extract_strided_slice %8 {offsets = [0, 0], sizes = [2, 128], strides = [1, 1]} : vector<2x256xf32> to vector<2x128xf32>
    %101 = arith.addf %99, %100 : vector<2x128xf32>
    %102 = vector.extract_strided_slice %101 {offsets = [0, 0], sizes = [2, 96], strides = [1, 1]} : vector<2x128xf32> to vector<2x96xf32>
    %103 = arith.negf %102 : vector<2x96xf32>
    %104 = math.exp %103 : vector<2x96xf32>
    %cst_17 = arith.constant 1.000000e+00 : f32
    %105 = vector.broadcast %cst_17 : f32 to vector<2x96xf32>
    %106 = arith.addf %105, %104 : vector<2x96xf32>
    %107 = arith.divf %105, %106 : vector<2x96xf32>
    %108 = vector.extract_strided_slice %107 {offsets = [0, 0], sizes = [2, 32], strides = [1, 1]} : vector<2x96xf32> to vector<2x32xf32>
    %109 = vector.extract_strided_slice %107 {offsets = [0, 32], sizes = [2, 32], strides = [1, 1]} : vector<2x96xf32> to vector<2x32xf32>
    %110 = vector.extract_strided_slice %107 {offsets = [0, 64], sizes = [2, 32], strides = [1, 1]} : vector<2x96xf32> to vector<2x32xf32>
    %111 = vector.extract_strided_slice %101 {offsets = [0, 96], sizes = [2, 32], strides = [1, 1]} : vector<2x128xf32> to vector<2x32xf32>
    %112 = math.tanh %111 : vector<2x32xf32>
    %113 = arith.mulf %109, %75 : vector<2x32xf32>
    %114 = arith.mulf %108, %112 : vector<2x32xf32>
    %115 = arith.addf %113, %114 : vector<2x32xf32>
    %116 = math.tanh %115 : vector<2x32xf32>
    %117 = arith.mulf %110, %116 : vector<2x32xf32>
    %118 = vector.extract_strided_slice %98 {offsets = [0, 128], sizes = [2, 128], strides = [1, 1]} : vector<2x256xf32> to vector<2x128xf32>
    %119 = vector.extract_strided_slice %11 {offsets = [0, 128], sizes = [2, 128], strides = [1, 1]} : vector<2x256xf32> to vector<2x128xf32>
    %120 = arith.addf %118, %119 : vector<2x128xf32>
    %121 = vector.extract_strided_slice %120 {offsets = [0, 0], sizes = [2, 96], strides = [1, 1]} : vector<2x128xf32> to vector<2x96xf32>
    %122 = arith.negf %121 : vector<2x96xf32>
    %123 = math.exp %122 : vector<2x96xf32>
    %cst_18 = arith.constant 1.000000e+00 : f32
    %124 = vector.broadcast %cst_18 : f32 to vector<2x96xf32>
    %125 = arith.addf %124, %123 : vector<2x96xf32>
    %126 = arith.divf %124, %125 : vector<2x96xf32>
    %127 = vector.extract_strided_slice %126 {offsets = [0, 0], sizes = [2, 32], strides = [1, 1]} : vector<2x96xf32> to vector<2x32xf32>
    %128 = vector.extract_strided_slice %126 {offsets = [0, 32], sizes = [2, 32], strides = [1, 1]} : vector<2x96xf32> to vector<2x32xf32>
    %129 = vector.extract_strided_slice %126 {offsets = [0, 64], sizes = [2, 32], strides = [1, 1]} : vector<2x96xf32> to vector<2x32xf32>
    %130 = vector.extract_strided_slice %120 {offsets = [0, 96], sizes = [2, 32], strides = [1, 1]} : vector<2x128xf32> to vector<2x32xf32>
    %131 = math.tanh %130 : vector<2x32xf32>
    %132 = arith.mulf %128, %94 : vector<2x32xf32>
    %133 = arith.mulf %127, %131 : vector<2x32xf32>
    %134 = arith.addf %132, %133 : vector<2x32xf32>
    %135 = math.tanh %134 : vector<2x32xf32>
    %136 = arith.mulf %129, %135 : vector<2x32xf32>
    %137 = tpu.concatenate %117, %136 in 1 : vector<2x32xf32>, vector<2x32xf32> -> vector<2x64xf32>
    %cst_19 = arith.constant dense<0.000000e+00> : vector<2x256xf32>
    %138 = tpu.matmul %137, %14, %cst_19 {dimension_numbers = #tpu.dot_dimension_numbers<[1], [0], [0], [1], [0, 0, 1, 1], [], []>} : vector<2x64xf32>, vector<64x256xf32>, vector<2x256xf32> -> vector<2x256xf32>
    %139 = vector.extract_strided_slice %138 {offsets = [0, 0], sizes = [2, 128], strides = [1, 1]} : vector<2x256xf32> to vector<2x128xf32>
    %140 = vector.extract_strided_slice %9 {offsets = [0, 0], sizes = [2, 128], strides = [1, 1]} : vector<2x256xf32> to vector<2x128xf32>
    %141 = arith.addf %139, %140 : vector<2x128xf32>
    %142 = vector.extract_strided_slice %141 {offsets = [0, 0], sizes = [2, 96], strides = [1, 1]} : vector<2x128xf32> to vector<2x96xf32>
    %143 = arith.negf %142 : vector<2x96xf32>
    %144 = math.exp %143 : vector<2x96xf32>
    %cst_20 = arith.constant 1.000000e+00 : f32
    %145 = vector.broadcast %cst_20 : f32 to vector<2x96xf32>
    %146 = arith.addf %145, %144 : vector<2x96xf32>
    %147 = arith.divf %145, %146 : vector<2x96xf32>
    %148 = vector.extract_strided_slice %147 {offsets = [0, 0], sizes = [2, 32], strides = [1, 1]} : vector<2x96xf32> to vector<2x32xf32>
    %149 = vector.extract_strided_slice %147 {offsets = [0, 32], sizes = [2, 32], strides = [1, 1]} : vector<2x96xf32> to vector<2x32xf32>
    %150 = vector.extract_strided_slice %147 {offsets = [0, 64], sizes = [2, 32], strides = [1, 1]} : vector<2x96xf32> to vector<2x32xf32>
    %151 = vector.extract_strided_slice %141 {offsets = [0, 96], sizes = [2, 32], strides = [1, 1]} : vector<2x128xf32> to vector<2x32xf32>
    %152 = math.tanh %151 : vector<2x32xf32>
    %153 = arith.mulf %149, %115 : vector<2x32xf32>
    %154 = arith.mulf %148, %152 : vector<2x32xf32>
    %155 = arith.addf %153, %154 : vector<2x32xf32>
    %156 = math.tanh %155 : vector<2x32xf32>
    %157 = arith.mulf %150, %156 : vector<2x32xf32>
    %158 = vector.extract_strided_slice %138 {offsets = [0, 128], sizes = [2, 128], strides = [1, 1]} : vector<2x256xf32> to vector<2x128xf32>
    %159 = vector.extract_strided_slice %10 {offsets = [0, 128], sizes = [2, 128], strides = [1, 1]} : vector<2x256xf32> to vector<2x128xf32>
    %160 = arith.addf %158, %159 : vector<2x128xf32>
    %161 = vector.extract_strided_slice %160 {offsets = [0, 0], sizes = [2, 96], strides = [1, 1]} : vector<2x128xf32> to vector<2x96xf32>
    %162 = arith.negf %161 : vector<2x96xf32>
    %163 = math.exp %162 : vector<2x96xf32>
    %cst_21 = arith.constant 1.000000e+00 : f32
    %164 = vector.broadcast %cst_21 : f32 to vector<2x96xf32>
    %165 = arith.addf %164, %163 : vector<2x96xf32>
    %166 = arith.divf %164, %165 : vector<2x96xf32>
    %167 = vector.extract_strided_slice %166 {offsets = [0, 0], sizes = [2, 32], strides = [1, 1]} : vector<2x96xf32> to vector<2x32xf32>
    %168 = vector.extract_strided_slice %166 {offsets = [0, 32], sizes = [2, 32], strides = [1, 1]} : vector<2x96xf32> to vector<2x32xf32>
    %169 = vector.extract_strided_slice %166 {offsets = [0, 64], sizes = [2, 32], strides = [1, 1]} : vector<2x96xf32> to vector<2x32xf32>
    %170 = vector.extract_strided_slice %160 {offsets = [0, 96], sizes = [2, 32], strides = [1, 1]} : vector<2x128xf32> to vector<2x32xf32>
    %171 = math.tanh %170 : vector<2x32xf32>
    %172 = arith.mulf %168, %134 : vector<2x32xf32>
    %173 = arith.mulf %167, %171 : vector<2x32xf32>
    %174 = arith.addf %172, %173 : vector<2x32xf32>
    %175 = math.tanh %174 : vector<2x32xf32>
    %176 = arith.mulf %169, %175 : vector<2x32xf32>
    %177 = tpu.concatenate %157, %176 in 1 : vector<2x32xf32>, vector<2x32xf32> -> vector<2x64xf32>
    %cst_22 = arith.constant dense<0.000000e+00> : vector<2x256xf32>
    %178 = tpu.matmul %177, %14, %cst_22 {dimension_numbers = #tpu.dot_dimension_numbers<[1], [0], [0], [1], [0, 0, 1, 1], [], []>} : vector<2x64xf32>, vector<64x256xf32>, vector<2x256xf32> -> vector<2x256xf32>
    %179 = vector.extract_strided_slice %178 {offsets = [0, 0], sizes = [2, 128], strides = [1, 1]} : vector<2x256xf32> to vector<2x128xf32>
    %180 = vector.extract_strided_slice %10 {offsets = [0, 0], sizes = [2, 128], strides = [1, 1]} : vector<2x256xf32> to vector<2x128xf32>
    %181 = arith.addf %179, %180 : vector<2x128xf32>
    %182 = vector.extract_strided_slice %181 {offsets = [0, 0], sizes = [2, 96], strides = [1, 1]} : vector<2x128xf32> to vector<2x96xf32>
    %183 = arith.negf %182 : vector<2x96xf32>
    %184 = math.exp %183 : vector<2x96xf32>
    %cst_23 = arith.constant 1.000000e+00 : f32
    %185 = vector.broadcast %cst_23 : f32 to vector<2x96xf32>
    %186 = arith.addf %185, %184 : vector<2x96xf32>
    %187 = arith.divf %185, %186 : vector<2x96xf32>
    %188 = vector.extract_strided_slice %187 {offsets = [0, 0], sizes = [2, 32], strides = [1, 1]} : vector<2x96xf32> to vector<2x32xf32>
    %189 = vector.extract_strided_slice %187 {offsets = [0, 32], sizes = [2, 32], strides = [1, 1]} : vector<2x96xf32> to vector<2x32xf32>
    %190 = vector.extract_strided_slice %187 {offsets = [0, 64], sizes = [2, 32], strides = [1, 1]} : vector<2x96xf32> to vector<2x32xf32>
    %191 = vector.extract_strided_slice %181 {offsets = [0, 96], sizes = [2, 32], strides = [1, 1]} : vector<2x128xf32> to vector<2x32xf32>
    %192 = math.tanh %191 : vector<2x32xf32>
    %193 = arith.mulf %189, %155 : vector<2x32xf32>
    %194 = arith.mulf %188, %192 : vector<2x32xf32>
    %195 = arith.addf %193, %194 : vector<2x32xf32>
    %196 = math.tanh %195 : vector<2x32xf32>
    %197 = arith.mulf %190, %196 : vector<2x32xf32>
    %198 = vector.extract_strided_slice %178 {offsets = [0, 128], sizes = [2, 128], strides = [1, 1]} : vector<2x256xf32> to vector<2x128xf32>
    %199 = vector.extract_strided_slice %9 {offsets = [0, 128], sizes = [2, 128], strides = [1, 1]} : vector<2x256xf32> to vector<2x128xf32>
    %200 = arith.addf %198, %199 : vector<2x128xf32>
    %201 = vector.extract_strided_slice %200 {offsets = [0, 0], sizes = [2, 96], strides = [1, 1]} : vector<2x128xf32> to vector<2x96xf32>
    %202 = arith.negf %201 : vector<2x96xf32>
    %203 = math.exp %202 : vector<2x96xf32>
    %cst_24 = arith.constant 1.000000e+00 : f32
    %204 = vector.broadcast %cst_24 : f32 to vector<2x96xf32>
    %205 = arith.addf %204, %203 : vector<2x96xf32>
    %206 = arith.divf %204, %205 : vector<2x96xf32>
    %207 = vector.extract_strided_slice %206 {offsets = [0, 0], sizes = [2, 32], strides = [1, 1]} : vector<2x96xf32> to vector<2x32xf32>
    %208 = vector.extract_strided_slice %206 {offsets = [0, 32], sizes = [2, 32], strides = [1, 1]} : vector<2x96xf32> to vector<2x32xf32>
    %209 = vector.extract_strided_slice %206 {offsets = [0, 64], sizes = [2, 32], strides = [1, 1]} : vector<2x96xf32> to vector<2x32xf32>
    %210 = vector.extract_strided_slice %200 {offsets = [0, 96], sizes = [2, 32], strides = [1, 1]} : vector<2x128xf32> to vector<2x32xf32>
    %211 = math.tanh %210 : vector<2x32xf32>
    %212 = arith.mulf %208, %174 : vector<2x32xf32>
    %213 = arith.mulf %207, %211 : vector<2x32xf32>
    %214 = arith.addf %212, %213 : vector<2x32xf32>
    %215 = math.tanh %214 : vector<2x32xf32>
    %216 = arith.mulf %209, %215 : vector<2x32xf32>
    %217 = tpu.concatenate %197, %216 in 1 : vector<2x32xf32>, vector<2x32xf32> -> vector<2x64xf32>
    %cst_25 = arith.constant dense<0.000000e+00> : vector<2x256xf32>
    %218 = tpu.matmul %217, %14, %cst_25 {dimension_numbers = #tpu.dot_dimension_numbers<[1], [0], [0], [1], [0, 0, 1, 1], [], []>} : vector<2x64xf32>, vector<64x256xf32>, vector<2x256xf32> -> vector<2x256xf32>
    %219 = vector.extract_strided_slice %218 {offsets = [0, 0], sizes = [2, 128], strides = [1, 1]} : vector<2x256xf32> to vector<2x128xf32>
    %220 = vector.extract_strided_slice %11 {offsets = [0, 0], sizes = [2, 128], strides = [1, 1]} : vector<2x256xf32> to vector<2x128xf32>
    %221 = arith.addf %219, %220 : vector<2x128xf32>
    %222 = vector.extract_strided_slice %221 {offsets = [0, 0], sizes = [2, 96], strides = [1, 1]} : vector<2x128xf32> to vector<2x96xf32>
    %223 = arith.negf %222 : vector<2x96xf32>
    %224 = math.exp %223 : vector<2x96xf32>
    %cst_26 = arith.constant 1.000000e+00 : f32
    %225 = vector.broadcast %cst_26 : f32 to vector<2x96xf32>
    %226 = arith.addf %225, %224 : vector<2x96xf32>
    %227 = arith.divf %225, %226 : vector<2x96xf32>
    %228 = vector.extract_strided_slice %227 {offsets = [0, 0], sizes = [2, 32], strides = [1, 1]} : vector<2x96xf32> to vector<2x32xf32>
    %229 = vector.extract_strided_slice %227 {offsets = [0, 32], sizes = [2, 32], strides = [1, 1]} : vector<2x96xf32> to vector<2x32xf32>
    %230 = vector.extract_strided_slice %227 {offsets = [0, 64], sizes = [2, 32], strides = [1, 1]} : vector<2x96xf32> to vector<2x32xf32>
    %231 = vector.extract_strided_slice %221 {offsets = [0, 96], sizes = [2, 32], strides = [1, 1]} : vector<2x128xf32> to vector<2x32xf32>
    %232 = math.tanh %231 : vector<2x32xf32>
    %233 = arith.mulf %229, %195 : vector<2x32xf32>
    %234 = arith.mulf %228, %232 : vector<2x32xf32>
    %235 = arith.addf %233, %234 : vector<2x32xf32>
    %236 = math.tanh %235 : vector<2x32xf32>
    %237 = arith.mulf %230, %236 : vector<2x32xf32>
    %238 = vector.extract_strided_slice %218 {offsets = [0, 128], sizes = [2, 128], strides = [1, 1]} : vector<2x256xf32> to vector<2x128xf32>
    %239 = vector.extract_strided_slice %8 {offsets = [0, 128], sizes = [2, 128], strides = [1, 1]} : vector<2x256xf32> to vector<2x128xf32>
    %240 = arith.addf %238, %239 : vector<2x128xf32>
    %241 = vector.extract_strided_slice %240 {offsets = [0, 0], sizes = [2, 96], strides = [1, 1]} : vector<2x128xf32> to vector<2x96xf32>
    %242 = arith.negf %241 : vector<2x96xf32>
    %243 = math.exp %242 : vector<2x96xf32>
    %cst_27 = arith.constant 1.000000e+00 : f32
    %244 = vector.broadcast %cst_27 : f32 to vector<2x96xf32>
    %245 = arith.addf %244, %243 : vector<2x96xf32>
    %246 = arith.divf %244, %245 : vector<2x96xf32>
    %247 = vector.extract_strided_slice %246 {offsets = [0, 0], sizes = [2, 32], strides = [1, 1]} : vector<2x96xf32> to vector<2x32xf32>
    %248 = vector.extract_strided_slice %246 {offsets = [0, 32], sizes = [2, 32], strides = [1, 1]} : vector<2x96xf32> to vector<2x32xf32>
    %249 = vector.extract_strided_slice %246 {offsets = [0, 64], sizes = [2, 32], strides = [1, 1]} : vector<2x96xf32> to vector<2x32xf32>
    %250 = vector.extract_strided_slice %240 {offsets = [0, 96], sizes = [2, 32], strides = [1, 1]} : vector<2x128xf32> to vector<2x32xf32>
    %251 = math.tanh %250 : vector<2x32xf32>
    %252 = arith.mulf %248, %214 : vector<2x32xf32>
    %253 = arith.mulf %247, %251 : vector<2x32xf32>
    %254 = arith.addf %252, %253 : vector<2x32xf32>
    %255 = math.tanh %254 : vector<2x32xf32>
    %256 = arith.mulf %249, %255 : vector<2x32xf32>
    %257 = tpu.concatenate %237, %256 in 1 : vector<2x32xf32>, vector<2x32xf32> -> vector<2x64xf32>
    %cst_28 = arith.constant dense<0.000000e+00> : vector<2x256xf32>
    %258 = tpu.matmul %257, %14, %cst_28 {dimension_numbers = #tpu.dot_dimension_numbers<[1], [0], [0], [1], [0, 0, 1, 1], [], []>} : vector<2x64xf32>, vector<64x256xf32>, vector<2x256xf32> -> vector<2x256xf32>
    %259 = vector.extract_strided_slice %258 {offsets = [0, 0], sizes = [2, 128], strides = [1, 1]} : vector<2x256xf32> to vector<2x128xf32>
    %260 = vector.extract_strided_slice %12 {offsets = [0, 0], sizes = [2, 128], strides = [1, 1]} : vector<2x256xf32> to vector<2x128xf32>
    %261 = arith.addf %259, %260 : vector<2x128xf32>
    %262 = vector.extract_strided_slice %261 {offsets = [0, 0], sizes = [2, 96], strides = [1, 1]} : vector<2x128xf32> to vector<2x96xf32>
    %263 = arith.negf %262 : vector<2x96xf32>
    %264 = math.exp %263 : vector<2x96xf32>
    %cst_29 = arith.constant 1.000000e+00 : f32
    %265 = vector.broadcast %cst_29 : f32 to vector<2x96xf32>
    %266 = arith.addf %265, %264 : vector<2x96xf32>
    %267 = arith.divf %265, %266 : vector<2x96xf32>
    %268 = vector.extract_strided_slice %267 {offsets = [0, 0], sizes = [2, 32], strides = [1, 1]} : vector<2x96xf32> to vector<2x32xf32>
    %269 = vector.extract_strided_slice %267 {offsets = [0, 32], sizes = [2, 32], strides = [1, 1]} : vector<2x96xf32> to vector<2x32xf32>
    %270 = vector.extract_strided_slice %267 {offsets = [0, 64], sizes = [2, 32], strides = [1, 1]} : vector<2x96xf32> to vector<2x32xf32>
    %271 = vector.extract_strided_slice %261 {offsets = [0, 96], sizes = [2, 32], strides = [1, 1]} : vector<2x128xf32> to vector<2x32xf32>
    %272 = math.tanh %271 : vector<2x32xf32>
    %273 = arith.mulf %269, %235 : vector<2x32xf32>
    %274 = arith.mulf %268, %272 : vector<2x32xf32>
    %275 = arith.addf %273, %274 : vector<2x32xf32>
    %276 = math.tanh %275 : vector<2x32xf32>
    %277 = arith.mulf %270, %276 : vector<2x32xf32>
    %278 = vector.extract_strided_slice %258 {offsets = [0, 128], sizes = [2, 128], strides = [1, 1]} : vector<2x256xf32> to vector<2x128xf32>
    %279 = vector.extract_strided_slice %7 {offsets = [0, 128], sizes = [2, 128], strides = [1, 1]} : vector<2x256xf32> to vector<2x128xf32>
    %280 = arith.addf %278, %279 : vector<2x128xf32>
    %281 = vector.extract_strided_slice %280 {offsets = [0, 0], sizes = [2, 96], strides = [1, 1]} : vector<2x128xf32> to vector<2x96xf32>
    %282 = arith.negf %281 : vector<2x96xf32>
    %283 = math.exp %282 : vector<2x96xf32>
    %cst_30 = arith.constant 1.000000e+00 : f32
    %284 = vector.broadcast %cst_30 : f32 to vector<2x96xf32>
    %285 = arith.addf %284, %283 : vector<2x96xf32>
    %286 = arith.divf %284, %285 : vector<2x96xf32>
    %287 = vector.extract_strided_slice %286 {offsets = [0, 0], sizes = [2, 32], strides = [1, 1]} : vector<2x96xf32> to vector<2x32xf32>
    %288 = vector.extract_strided_slice %286 {offsets = [0, 32], sizes = [2, 32], strides = [1, 1]} : vector<2x96xf32> to vector<2x32xf32>
    %289 = vector.extract_strided_slice %286 {offsets = [0, 64], sizes = [2, 32], strides = [1, 1]} : vector<2x96xf32> to vector<2x32xf32>
    %290 = vector.extract_strided_slice %280 {offsets = [0, 96], sizes = [2, 32], strides = [1, 1]} : vector<2x128xf32> to vector<2x32xf32>
    %291 = math.tanh %290 : vector<2x32xf32>
    %292 = arith.mulf %288, %254 : vector<2x32xf32>
    %293 = arith.mulf %287, %291 : vector<2x32xf32>
    %294 = arith.addf %292, %293 : vector<2x32xf32>
    %295 = math.tanh %294 : vector<2x32xf32>
    %296 = arith.mulf %289, %295 : vector<2x32xf32>
    %297 = tpu.concatenate %277, %296 in 1 : vector<2x32xf32>, vector<2x32xf32> -> vector<2x64xf32>
    %cst_31 = arith.constant dense<0.000000e+00> : vector<2x256xf32>
    %298 = tpu.matmul %297, %14, %cst_31 {dimension_numbers = #tpu.dot_dimension_numbers<[1], [0], [0], [1], [0, 0, 1, 1], [], []>} : vector<2x64xf32>, vector<64x256xf32>, vector<2x256xf32> -> vector<2x256xf32>
    %299 = vector.extract_strided_slice %298 {offsets = [0, 0], sizes = [2, 128], strides = [1, 1]} : vector<2x256xf32> to vector<2x128xf32>
    %300 = vector.extract_strided_slice %13 {offsets = [0, 0], sizes = [2, 128], strides = [1, 1]} : vector<2x256xf32> to vector<2x128xf32>
    %301 = arith.addf %299, %300 : vector<2x128xf32>
    %302 = vector.extract_strided_slice %301 {offsets = [0, 0], sizes = [2, 96], strides = [1, 1]} : vector<2x128xf32> to vector<2x96xf32>
    %303 = arith.negf %302 : vector<2x96xf32>
    %304 = math.exp %303 : vector<2x96xf32>
    %cst_32 = arith.constant 1.000000e+00 : f32
    %305 = vector.broadcast %cst_32 : f32 to vector<2x96xf32>
    %306 = arith.addf %305, %304 : vector<2x96xf32>
    %307 = arith.divf %305, %306 : vector<2x96xf32>
    %308 = vector.extract_strided_slice %307 {offsets = [0, 0], sizes = [2, 32], strides = [1, 1]} : vector<2x96xf32> to vector<2x32xf32>
    %309 = vector.extract_strided_slice %307 {offsets = [0, 32], sizes = [2, 32], strides = [1, 1]} : vector<2x96xf32> to vector<2x32xf32>
    %310 = vector.extract_strided_slice %307 {offsets = [0, 64], sizes = [2, 32], strides = [1, 1]} : vector<2x96xf32> to vector<2x32xf32>
    %311 = vector.extract_strided_slice %301 {offsets = [0, 96], sizes = [2, 32], strides = [1, 1]} : vector<2x128xf32> to vector<2x32xf32>
    %312 = math.tanh %311 : vector<2x32xf32>
    %313 = arith.mulf %309, %275 : vector<2x32xf32>
    %314 = arith.mulf %308, %312 : vector<2x32xf32>
    %315 = arith.addf %313, %314 : vector<2x32xf32>
    %316 = math.tanh %315 : vector<2x32xf32>
    %317 = arith.mulf %310, %316 : vector<2x32xf32>
    %318 = vector.extract_strided_slice %298 {offsets = [0, 128], sizes = [2, 128], strides = [1, 1]} : vector<2x256xf32> to vector<2x128xf32>
    %319 = vector.extract_strided_slice %6 {offsets = [0, 128], sizes = [2, 128], strides = [1, 1]} : vector<2x256xf32> to vector<2x128xf32>
    %320 = arith.addf %318, %319 : vector<2x128xf32>
    %321 = vector.extract_strided_slice %320 {offsets = [0, 0], sizes = [2, 96], strides = [1, 1]} : vector<2x128xf32> to vector<2x96xf32>
    %322 = arith.negf %321 : vector<2x96xf32>
    %323 = math.exp %322 : vector<2x96xf32>
    %cst_33 = arith.constant 1.000000e+00 : f32
    %324 = vector.broadcast %cst_33 : f32 to vector<2x96xf32>
    %325 = arith.addf %324, %323 : vector<2x96xf32>
    %326 = arith.divf %324, %325 : vector<2x96xf32>
    %327 = vector.extract_strided_slice %326 {offsets = [0, 0], sizes = [2, 32], strides = [1, 1]} : vector<2x96xf32> to vector<2x32xf32>
    %328 = vector.extract_strided_slice %326 {offsets = [0, 32], sizes = [2, 32], strides = [1, 1]} : vector<2x96xf32> to vector<2x32xf32>
    %329 = vector.extract_strided_slice %326 {offsets = [0, 64], sizes = [2, 32], strides = [1, 1]} : vector<2x96xf32> to vector<2x32xf32>
    %330 = vector.extract_strided_slice %320 {offsets = [0, 96], sizes = [2, 32], strides = [1, 1]} : vector<2x128xf32> to vector<2x32xf32>
    %331 = math.tanh %330 : vector<2x32xf32>
    %332 = arith.mulf %328, %294 : vector<2x32xf32>
    %333 = arith.mulf %327, %331 : vector<2x32xf32>
    %334 = arith.addf %332, %333 : vector<2x32xf32>
    %335 = math.tanh %334 : vector<2x32xf32>
    %336 = arith.mulf %329, %335 : vector<2x32xf32>
    %337 = tpu.concatenate %37, %336 in 1 : vector<2x32xf32>, vector<2x32xf32> -> vector<2x64xf32>
    %338 = tpu.concatenate %77, %296 in 1 : vector<2x32xf32>, vector<2x32xf32> -> vector<2x64xf32>
    %339 = tpu.concatenate %117, %256 in 1 : vector<2x32xf32>, vector<2x32xf32> -> vector<2x64xf32>
    %340 = tpu.concatenate %157, %216 in 1 : vector<2x32xf32>, vector<2x32xf32> -> vector<2x64xf32>
    %341 = tpu.concatenate %197, %176 in 1 : vector<2x32xf32>, vector<2x32xf32> -> vector<2x64xf32>
    %342 = tpu.concatenate %237, %136 in 1 : vector<2x32xf32>, vector<2x32xf32> -> vector<2x64xf32>
    %343 = tpu.concatenate %277, %96 in 1 : vector<2x32xf32>, vector<2x32xf32> -> vector<2x64xf32>
    %344 = tpu.concatenate %317, %56 in 1 : vector<2x32xf32>, vector<2x32xf32> -> vector<2x64xf32>
    %345 = tpu.concatenate %337, %338, %339, %340, %341, %342, %343, %344 in 0 : vector<2x64xf32>, vector<2x64xf32>, vector<2x64xf32>, vector<2x64xf32>, vector<2x64xf32>, vector<2x64xf32>, vector<2x64xf32>, vector<2x64xf32> -> vector<16x64xf32>
    %c0_34 = arith.constant 0 : index
    %c0_35 = arith.constant 0 : index
    %346 = vector.load %arg4[%c0_34, %c0_35] : memref<64x8xf32, #tpu.memory_space<vmem>>, vector<64x8xf32>
    %cst_36 = arith.constant dense<0.000000e+00> : vector<16x8xf32>
    %347 = tpu.matmul %345, %346, %cst_36 {dimension_numbers = #tpu.dot_dimension_numbers<[1], [0], [0], [1], [0, 0, 1, 1], [], []>} : vector<16x64xf32>, vector<64x8xf32>, vector<16x8xf32> -> vector<16x8xf32>
    %c0_37 = arith.constant 0 : index
    %c0_38 = arith.constant 0 : index
    %348 = vector.load %arg5[%c0_37, %c0_38] : memref<1x8xf32, #tpu.memory_space<vmem>>, vector<1x8xf32>
    %349 = vector.broadcast %348 : vector<1x8xf32> to vector<16x8xf32>
    %350 = arith.addf %347, %349 : vector<16x8xf32>
    %c0_39 = arith.constant 0 : index
    %c0_40 = arith.constant 0 : index
    %351 = vector.load %arg9[%c0_39, %c0_40] : memref<16x8xf32, #tpu.memory_space<vmem>>, vector<16x8xf32>
    tpu.vector_store %arg9[%c0_39, %c0_40], %350 {strides = array<i32>} : memref<16x8xf32, #tpu.memory_space<vmem>>, vector<16x8xf32>,
    %c0_41 = arith.constant 0 : index
    %c0_42 = arith.constant 0 : index
    %352 = vector.load %arg8[%c0_41, %c0_42] : memref<8x8xf32, #tpu.memory_space<vmem>>, vector<8x8xf32>
    %353 = tpu.iota {dimensions = array<i32: 1>} : vector<2x8x8xi32>
    %c0_43 = arith.constant 0 : index
    %c0_44 = arith.constant 0 : index
    %354 = vector.load %arg6[%c0_43, %c0_44] : memref<1x8xf32, #tpu.memory_space<vmem>>, vector<1x8xf32>
    %355 = vector.extract_strided_slice %350 {offsets = [0, 0], sizes = [2, 8], strides = [1, 1]} : vector<16x8xf32> to vector<2x8xf32>
    %356 = vector.broadcast %354 : vector<1x8xf32> to vector<2x8xf32>
    %357 = arith.addf %356, %355 : vector<2x8xf32>
    %358 = vector.shape_cast %357 : vector<2x8xf32> to vector<2x8x1xf32>
    %359 = vector.shape_cast %352 : vector<8x8xf32> to vector<1x8x8xf32>
    %360 = vector.broadcast %358 : vector<2x8x1xf32> to vector<2x8x8xf32>
    %361 = vector.broadcast %359 : vector<1x8x8xf32> to vector<2x8x8xf32>
    %362 = arith.addf %360, %361 : vector<2x8x8xf32>
    %cst_45 = arith.constant dense<0xFF800000> : vector<2x8xf32>
    %363 = vector.multi_reduction <maximumf>, %362, %cst_45 [1] : vector<2x8x8xf32> to vector<2x8xf32>
    %364 = vector.shape_cast %363 : vector<2x8xf32> to vector<2x1x8xf32>
    %365 = vector.broadcast %364 : vector<2x1x8xf32> to vector<2x8x8xf32>
    %366 = arith.cmpf oeq, %362, %365 : vector<2x8x8xf32>
    %c8_i32 = arith.constant 8 : i32
    %367 = vector.broadcast %c8_i32 : i32 to vector<2x8x8xi32>
    %368 = arith.select %366, %353, %367 : vector<2x8x8xi1>, vector<2x8x8xi32>
    %cst_46 = arith.constant dense<2147483647> : vector<2x8xi32>
    %369 = vector.multi_reduction <minsi>, %368, %cst_46 [1] : vector<2x8x8xi32> to vector<2x8xi32>
    %370 = vector.extract_strided_slice %350 {offsets = [2, 0], sizes = [2, 8], strides = [1, 1]} : vector<16x8xf32> to vector<2x8xf32>
    %371 = arith.addf %363, %370 : vector<2x8xf32>
    %372 = vector.shape_cast %371 : vector<2x8xf32> to vector<2x8x1xf32>
    %373 = vector.shape_cast %352 : vector<8x8xf32> to vector<1x8x8xf32>
    %374 = vector.broadcast %372 : vector<2x8x1xf32> to vector<2x8x8xf32>
    %375 = vector.broadcast %373 : vector<1x8x8xf32> to vector<2x8x8xf32>
    %376 = arith.addf %374, %375 : vector<2x8x8xf32>
    %cst_47 = arith.constant dense<0xFF800000> : vector<2x8xf32>
    %377 = vector.multi_reduction <maximumf>, %376, %cst_47 [1] : vector<2x8x8xf32> to vector<2x8xf32>
    %378 = vector.shape_cast %377 : vector<2x8xf32> to vector<2x1x8xf32>
    %379 = vector.broadcast %378 : vector<2x1x8xf32> to vector<2x8x8xf32>
    %380 = arith.cmpf oeq, %376, %379 : vector<2x8x8xf32>
    %c8_i32_48 = arith.constant 8 : i32
    %381 = vector.broadcast %c8_i32_48 : i32 to vector<2x8x8xi32>
    %382 = arith.select %380, %353, %381 : vector<2x8x8xi1>, vector<2x8x8xi32>
    %cst_49 = arith.constant dense<2147483647> : vector<2x8xi32>
    %383 = vector.multi_reduction <minsi>, %382, %cst_49 [1] : vector<2x8x8xi32> to vector<2x8xi32>
    %384 = vector.extract_strided_slice %350 {offsets = [4, 0], sizes = [2, 8], strides = [1, 1]} : vector<16x8xf32> to vector<2x8xf32>
    %385 = arith.addf %377, %384 : vector<2x8xf32>
    %386 = vector.shape_cast %385 : vector<2x8xf32> to vector<2x8x1xf32>
    %387 = vector.shape_cast %352 : vector<8x8xf32> to vector<1x8x8xf32>
    %388 = vector.broadcast %386 : vector<2x8x1xf32> to vector<2x8x8xf32>
    %389 = vector.broadcast %387 : vector<1x8x8xf32> to vector<2x8x8xf32>
    %390 = arith.addf %388, %389 : vector<2x8x8xf32>
    %cst_50 = arith.constant dense<0xFF800000> : vector<2x8xf32>
    %391 = vector.multi_reduction <maximumf>, %390, %cst_50 [1] : vector<2x8x8xf32> to vector<2x8xf32>
    %392 = vector.shape_cast %391 : vector<2x8xf32> to vector<2x1x8xf32>
    %393 = vector.broadcast %392 : vector<2x1x8xf32> to vector<2x8x8xf32>
    %394 = arith.cmpf oeq, %390, %393 : vector<2x8x8xf32>
    %c8_i32_51 = arith.constant 8 : i32
    %395 = vector.broadcast %c8_i32_51 : i32 to vector<2x8x8xi32>
    %396 = arith.select %394, %353, %395 : vector<2x8x8xi1>, vector<2x8x8xi32>
    %cst_52 = arith.constant dense<2147483647> : vector<2x8xi32>
    %397 = vector.multi_reduction <minsi>, %396, %cst_52 [1] : vector<2x8x8xi32> to vector<2x8xi32>
    %398 = vector.extract_strided_slice %350 {offsets = [6, 0], sizes = [2, 8], strides = [1, 1]} : vector<16x8xf32> to vector<2x8xf32>
    %399 = arith.addf %391, %398 : vector<2x8xf32>
    %400 = vector.shape_cast %399 : vector<2x8xf32> to vector<2x8x1xf32>
    %401 = vector.shape_cast %352 : vector<8x8xf32> to vector<1x8x8xf32>
    %402 = vector.broadcast %400 : vector<2x8x1xf32> to vector<2x8x8xf32>
    %403 = vector.broadcast %401 : vector<1x8x8xf32> to vector<2x8x8xf32>
    %404 = arith.addf %402, %403 : vector<2x8x8xf32>
    %cst_53 = arith.constant dense<0xFF800000> : vector<2x8xf32>
    %405 = vector.multi_reduction <maximumf>, %404, %cst_53 [1] : vector<2x8x8xf32> to vector<2x8xf32>
    %406 = vector.shape_cast %405 : vector<2x8xf32> to vector<2x1x8xf32>
    %407 = vector.broadcast %406 : vector<2x1x8xf32> to vector<2x8x8xf32>
    %408 = arith.cmpf oeq, %404, %407 : vector<2x8x8xf32>
    %c8_i32_54 = arith.constant 8 : i32
    %409 = vector.broadcast %c8_i32_54 : i32 to vector<2x8x8xi32>
    %410 = arith.select %408, %353, %409 : vector<2x8x8xi1>, vector<2x8x8xi32>
    %cst_55 = arith.constant dense<2147483647> : vector<2x8xi32>
    %411 = vector.multi_reduction <minsi>, %410, %cst_55 [1] : vector<2x8x8xi32> to vector<2x8xi32>
    %412 = vector.extract_strided_slice %350 {offsets = [8, 0], sizes = [2, 8], strides = [1, 1]} : vector<16x8xf32> to vector<2x8xf32>
    %413 = arith.addf %405, %412 : vector<2x8xf32>
    %414 = vector.shape_cast %413 : vector<2x8xf32> to vector<2x8x1xf32>
    %415 = vector.shape_cast %352 : vector<8x8xf32> to vector<1x8x8xf32>
    %416 = vector.broadcast %414 : vector<2x8x1xf32> to vector<2x8x8xf32>
    %417 = vector.broadcast %415 : vector<1x8x8xf32> to vector<2x8x8xf32>
    %418 = arith.addf %416, %417 : vector<2x8x8xf32>
    %cst_56 = arith.constant dense<0xFF800000> : vector<2x8xf32>
    %419 = vector.multi_reduction <maximumf>, %418, %cst_56 [1] : vector<2x8x8xf32> to vector<2x8xf32>
    %420 = vector.shape_cast %419 : vector<2x8xf32> to vector<2x1x8xf32>
    %421 = vector.broadcast %420 : vector<2x1x8xf32> to vector<2x8x8xf32>
    %422 = arith.cmpf oeq, %418, %421 : vector<2x8x8xf32>
    %c8_i32_57 = arith.constant 8 : i32
    %423 = vector.broadcast %c8_i32_57 : i32 to vector<2x8x8xi32>
    %424 = arith.select %422, %353, %423 : vector<2x8x8xi1>, vector<2x8x8xi32>
    %cst_58 = arith.constant dense<2147483647> : vector<2x8xi32>
    %425 = vector.multi_reduction <minsi>, %424, %cst_58 [1] : vector<2x8x8xi32> to vector<2x8xi32>
    %426 = vector.extract_strided_slice %350 {offsets = [10, 0], sizes = [2, 8], strides = [1, 1]} : vector<16x8xf32> to vector<2x8xf32>
    %427 = arith.addf %419, %426 : vector<2x8xf32>
    %428 = vector.shape_cast %427 : vector<2x8xf32> to vector<2x8x1xf32>
    %429 = vector.shape_cast %352 : vector<8x8xf32> to vector<1x8x8xf32>
    %430 = vector.broadcast %428 : vector<2x8x1xf32> to vector<2x8x8xf32>
    %431 = vector.broadcast %429 : vector<1x8x8xf32> to vector<2x8x8xf32>
    %432 = arith.addf %430, %431 : vector<2x8x8xf32>
    %cst_59 = arith.constant dense<0xFF800000> : vector<2x8xf32>
    %433 = vector.multi_reduction <maximumf>, %432, %cst_59 [1] : vector<2x8x8xf32> to vector<2x8xf32>
    %434 = vector.shape_cast %433 : vector<2x8xf32> to vector<2x1x8xf32>
    %435 = vector.broadcast %434 : vector<2x1x8xf32> to vector<2x8x8xf32>
    %436 = arith.cmpf oeq, %432, %435 : vector<2x8x8xf32>
    %c8_i32_60 = arith.constant 8 : i32
    %437 = vector.broadcast %c8_i32_60 : i32 to vector<2x8x8xi32>
    %438 = arith.select %436, %353, %437 : vector<2x8x8xi1>, vector<2x8x8xi32>
    %cst_61 = arith.constant dense<2147483647> : vector<2x8xi32>
    %439 = vector.multi_reduction <minsi>, %438, %cst_61 [1] : vector<2x8x8xi32> to vector<2x8xi32>
    %440 = vector.extract_strided_slice %350 {offsets = [12, 0], sizes = [2, 8], strides = [1, 1]} : vector<16x8xf32> to vector<2x8xf32>
    %441 = arith.addf %433, %440 : vector<2x8xf32>
    %442 = vector.shape_cast %441 : vector<2x8xf32> to vector<2x8x1xf32>
    %443 = vector.shape_cast %352 : vector<8x8xf32> to vector<1x8x8xf32>
    %444 = vector.broadcast %442 : vector<2x8x1xf32> to vector<2x8x8xf32>
    %445 = vector.broadcast %443 : vector<1x8x8xf32> to vector<2x8x8xf32>
    %446 = arith.addf %444, %445 : vector<2x8x8xf32>
    %cst_62 = arith.constant dense<0xFF800000> : vector<2x8xf32>
    %447 = vector.multi_reduction <maximumf>, %446, %cst_62 [1] : vector<2x8x8xf32> to vector<2x8xf32>
    %448 = vector.shape_cast %447 : vector<2x8xf32> to vector<2x1x8xf32>
    %449 = vector.broadcast %448 : vector<2x1x8xf32> to vector<2x8x8xf32>
    %450 = arith.cmpf oeq, %446, %449 : vector<2x8x8xf32>
    %c8_i32_63 = arith.constant 8 : i32
    %451 = vector.broadcast %c8_i32_63 : i32 to vector<2x8x8xi32>
    %452 = arith.select %450, %353, %451 : vector<2x8x8xi1>, vector<2x8x8xi32>
    %cst_64 = arith.constant dense<2147483647> : vector<2x8xi32>
    %453 = vector.multi_reduction <minsi>, %452, %cst_64 [1] : vector<2x8x8xi32> to vector<2x8xi32>
    %454 = vector.extract_strided_slice %350 {offsets = [14, 0], sizes = [2, 8], strides = [1, 1]} : vector<16x8xf32> to vector<2x8xf32>
    %455 = arith.addf %447, %454 : vector<2x8xf32>
    %c0_65 = arith.constant 0 : index
    %c0_66 = arith.constant 0 : index
    %456 = vector.load %arg7[%c0_65, %c0_66] : memref<1x8xf32, #tpu.memory_space<vmem>>, vector<1x8xf32>
    %457 = vector.broadcast %456 : vector<1x8xf32> to vector<2x8xf32>
    %458 = arith.addf %455, %457 : vector<2x8xf32>
    %459 = tpu.iota {dimensions = array<i32: 1>} : vector<2x8xi32>
    %cst_67 = arith.constant dense<0xFF800000> : vector<2xf32>
    %460 = vector.multi_reduction <maximumf>, %458, %cst_67 [1] : vector<2x8xf32> to vector<2xf32>
    %461 = vector.shape_cast %460 : vector<2xf32> to vector<2x1xf32>
    %462 = vector.broadcast %461 : vector<2x1xf32> to vector<2x8xf32>
    %463 = arith.cmpf oeq, %458, %462 : vector<2x8xf32>
    %c8_i32_68 = arith.constant 8 : i32
    %464 = vector.broadcast %c8_i32_68 : i32 to vector<2x8xi32>
    %465 = arith.select %463, %459, %464 : vector<2x8xi1>, vector<2x8xi32>
    %cst_69 = arith.constant dense<2147483647> : vector<2xi32>
    %466 = vector.multi_reduction <minsi>, %465, %cst_69 [1] : vector<2x8xi32> to vector<2xi32>
    %467 = vector.shape_cast %466 : vector<2xi32> to vector<2x1xi32>
    %468 = tpu.iota {dimensions = array<i32: 1>} : vector<2x8xi32>
    %c0_i32 = arith.constant 0 : i32
    %469 = vector.broadcast %c0_i32 : i32 to vector<2x8xi32>
    %c7_i32 = arith.constant 7 : i32
    %470 = vector.broadcast %c7_i32 : i32 to vector<2x8xi32>
    %471 = arith.cmpi eq, %468, %470 : vector<2x8xi32>
    %472 = vector.shape_cast %467 : vector<2x1xi32> to vector<2x1xi32>
    %473 = vector.broadcast %472 : vector<2x1xi32> to vector<2x8xi32>
    %474 = arith.select %471, %473, %469 : vector<2x8xi1>, vector<2x8xi32>
    %475 = vector.broadcast %467 : vector<2x1xi32> to vector<2x8xi32>
    %476 = arith.cmpi eq, %459, %475 : vector<2x8xi32>
    %c0_i32_70 = arith.constant 0 : i32
    %477 = vector.broadcast %c0_i32_70 : i32 to vector<2x8xi32>
    %478 = arith.select %476, %453, %477 : vector<2x8xi1>, vector<2x8xi32>
    %cst_71 = arith.constant dense<0> : vector<2xi32>
    %479 = vector.multi_reduction <add>, %478, %cst_71 [1] : vector<2x8xi32> to vector<2xi32>
    %480 = vector.shape_cast %479 : vector<2xi32> to vector<2x1xi32>
    %c6_i32 = arith.constant 6 : i32
    %481 = vector.broadcast %c6_i32 : i32 to vector<2x8xi32>
    %482 = arith.cmpi eq, %468, %481 : vector<2x8xi32>
    %483 = vector.shape_cast %480 : vector<2x1xi32> to vector<2x1xi32>
    %484 = vector.broadcast %483 : vector<2x1xi32> to vector<2x8xi32>
    %485 = arith.select %482, %484, %474 : vector<2x8xi1>, vector<2x8xi32>
    %486 = vector.broadcast %480 : vector<2x1xi32> to vector<2x8xi32>
    %487 = arith.cmpi eq, %459, %486 : vector<2x8xi32>
    %c0_i32_72 = arith.constant 0 : i32
    %488 = vector.broadcast %c0_i32_72 : i32 to vector<2x8xi32>
    %489 = arith.select %487, %439, %488 : vector<2x8xi1>, vector<2x8xi32>
    %cst_73 = arith.constant dense<0> : vector<2xi32>
    %490 = vector.multi_reduction <add>, %489, %cst_73 [1] : vector<2x8xi32> to vector<2xi32>
    %491 = vector.shape_cast %490 : vector<2xi32> to vector<2x1xi32>
    %c5_i32 = arith.constant 5 : i32
    %492 = vector.broadcast %c5_i32 : i32 to vector<2x8xi32>
    %493 = arith.cmpi eq, %468, %492 : vector<2x8xi32>
    %494 = vector.shape_cast %491 : vector<2x1xi32> to vector<2x1xi32>
    %495 = vector.broadcast %494 : vector<2x1xi32> to vector<2x8xi32>
    %496 = arith.select %493, %495, %485 : vector<2x8xi1>, vector<2x8xi32>
    %497 = vector.broadcast %491 : vector<2x1xi32> to vector<2x8xi32>
    %498 = arith.cmpi eq, %459, %497 : vector<2x8xi32>
    %c0_i32_74 = arith.constant 0 : i32
    %499 = vector.broadcast %c0_i32_74 : i32 to vector<2x8xi32>
    %500 = arith.select %498, %425, %499 : vector<2x8xi1>, vector<2x8xi32>
    %cst_75 = arith.constant dense<0> : vector<2xi32>
    %501 = vector.multi_reduction <add>, %500, %cst_75 [1] : vector<2x8xi32> to vector<2xi32>
    %502 = vector.shape_cast %501 : vector<2xi32> to vector<2x1xi32>
    %c4_i32 = arith.constant 4 : i32
    %503 = vector.broadcast %c4_i32 : i32 to vector<2x8xi32>
    %504 = arith.cmpi eq, %468, %503 : vector<2x8xi32>
    %505 = vector.shape_cast %502 : vector<2x1xi32> to vector<2x1xi32>
    %506 = vector.broadcast %505 : vector<2x1xi32> to vector<2x8xi32>
    %507 = arith.select %504, %506, %496 : vector<2x8xi1>, vector<2x8xi32>
    %508 = vector.broadcast %502 : vector<2x1xi32> to vector<2x8xi32>
    %509 = arith.cmpi eq, %459, %508 : vector<2x8xi32>
    %c0_i32_76 = arith.constant 0 : i32
    %510 = vector.broadcast %c0_i32_76 : i32 to vector<2x8xi32>
    %511 = arith.select %509, %411, %510 : vector<2x8xi1>, vector<2x8xi32>
    %cst_77 = arith.constant dense<0> : vector<2xi32>
    %512 = vector.multi_reduction <add>, %511, %cst_77 [1] : vector<2x8xi32> to vector<2xi32>
    %513 = vector.shape_cast %512 : vector<2xi32> to vector<2x1xi32>
    %c3_i32 = arith.constant 3 : i32
    %514 = vector.broadcast %c3_i32 : i32 to vector<2x8xi32>
    %515 = arith.cmpi eq, %468, %514 : vector<2x8xi32>
    %516 = vector.shape_cast %513 : vector<2x1xi32> to vector<2x1xi32>
    %517 = vector.broadcast %516 : vector<2x1xi32> to vector<2x8xi32>
    %518 = arith.select %515, %517, %507 : vector<2x8xi1>, vector<2x8xi32>
    %519 = vector.broadcast %513 : vector<2x1xi32> to vector<2x8xi32>
    %520 = arith.cmpi eq, %459, %519 : vector<2x8xi32>
    %c0_i32_78 = arith.constant 0 : i32
    %521 = vector.broadcast %c0_i32_78 : i32 to vector<2x8xi32>
    %522 = arith.select %520, %397, %521 : vector<2x8xi1>, vector<2x8xi32>
    %cst_79 = arith.constant dense<0> : vector<2xi32>
    %523 = vector.multi_reduction <add>, %522, %cst_79 [1] : vector<2x8xi32> to vector<2xi32>
    %524 = vector.shape_cast %523 : vector<2xi32> to vector<2x1xi32>
    %c2_i32 = arith.constant 2 : i32
    %525 = vector.broadcast %c2_i32 : i32 to vector<2x8xi32>
    %526 = arith.cmpi eq, %468, %525 : vector<2x8xi32>
    %527 = vector.shape_cast %524 : vector<2x1xi32> to vector<2x1xi32>
    %528 = vector.broadcast %527 : vector<2x1xi32> to vector<2x8xi32>
    %529 = arith.select %526, %528, %518 : vector<2x8xi1>, vector<2x8xi32>
    %530 = vector.broadcast %524 : vector<2x1xi32> to vector<2x8xi32>
    %531 = arith.cmpi eq, %459, %530 : vector<2x8xi32>
    %c0_i32_80 = arith.constant 0 : i32
    %532 = vector.broadcast %c0_i32_80 : i32 to vector<2x8xi32>
    %533 = arith.select %531, %383, %532 : vector<2x8xi1>, vector<2x8xi32>
    %cst_81 = arith.constant dense<0> : vector<2xi32>
    %534 = vector.multi_reduction <add>, %533, %cst_81 [1] : vector<2x8xi32> to vector<2xi32>
    %535 = vector.shape_cast %534 : vector<2xi32> to vector<2x1xi32>
    %c1_i32 = arith.constant 1 : i32
    %536 = vector.broadcast %c1_i32 : i32 to vector<2x8xi32>
    %537 = arith.cmpi eq, %468, %536 : vector<2x8xi32>
    %538 = vector.shape_cast %535 : vector<2x1xi32> to vector<2x1xi32>
    %539 = vector.broadcast %538 : vector<2x1xi32> to vector<2x8xi32>
    %540 = arith.select %537, %539, %529 : vector<2x8xi1>, vector<2x8xi32>
    %541 = vector.broadcast %535 : vector<2x1xi32> to vector<2x8xi32>
    %542 = arith.cmpi eq, %459, %541 : vector<2x8xi32>
    %c0_i32_82 = arith.constant 0 : i32
    %543 = vector.broadcast %c0_i32_82 : i32 to vector<2x8xi32>
    %544 = arith.select %542, %369, %543 : vector<2x8xi1>, vector<2x8xi32>
    %cst_83 = arith.constant dense<0> : vector<2xi32>
    %545 = vector.multi_reduction <add>, %544, %cst_83 [1] : vector<2x8xi32> to vector<2xi32>
    %546 = vector.shape_cast %545 : vector<2xi32> to vector<2x1xi32>
    %c0_i32_84 = arith.constant 0 : i32
    %547 = vector.broadcast %c0_i32_84 : i32 to vector<2x8xi32>
    %548 = arith.cmpi eq, %468, %547 : vector<2x8xi32>
    %549 = vector.shape_cast %546 : vector<2x1xi32> to vector<2x1xi32>
    %550 = vector.broadcast %549 : vector<2x1xi32> to vector<2x8xi32>
    %551 = arith.select %548, %550, %540 : vector<2x8xi1>, vector<2x8xi32>
    %c0_85 = arith.constant 0 : index
    %c0_86 = arith.constant 0 : index
    %552 = vector.load %arg10[%c0_85, %c0_86] : memref<2x8xi32, #tpu.memory_space<vmem>>, vector<2x8xi32>
    tpu.vector_store %arg10[%c0_85, %c0_86], %551 {strides = array<i32>} : memref<2x8xi32, #tpu.memory_space<vmem>>, vector<2x8xi32>,
    return
  }
}

</mosaic_0001>

<bundles_post_ra>
// kernel: bilstm_crf_forward.1
= control target key start
LH: loop header
LB: loop body
LE: loop exit
PB: predicated region body
PF: predicated region fallthrough
CT: control target
= control target key end

     0   :  { %v2376_v7 = vmov 0.0   ;;  %vm57_vm0 = vcmask 261120   ;;  %s2995_s0 = inlined_call_operand.vmem [shape: f32[16,32], index: 0, kind: input, shape index: {}]   ;;  %s2996_s1 = inlined_call_operand.vmem [shape: f32[32,256], index: 1, kind: input, shape index: {}]   ;;  %s2997_s2 = inlined_call_operand.vmem [shape: f32[1,256], index: 2, kind: input, shape index: {}]   ;;  %s2998_s3 = inlined_call_operand.vmem [shape: f32[64,256], index: 3, kind: input, shape index: {}]   ;;  %s2999_s4 = inlined_call_operand.vmem [shape: f32[64,8], index: 4, kind: input, shape index: {}]   ;;  %s3000_s5 = inlined_call_operand.vmem [shape: f32[1,8], index: 5, kind: input, shape index: {}]   ;;  %s3001_s6 = inlined_call_operand.vmem [shape: f32[1,8], index: 6, kind: input, shape index: {}]   ;;  %s3002_s7 = inlined_call_operand.vmem [shape: f32[1,8], index: 7, kind: input, shape index: {}]   ;;  %s3003_s8 = inlined_call_operand.vmem [shape: f32[8,8], index: 8, kind: input, shape index: {}]   ;;  %s3004_s9 = inlined_call_operand.vmem [shape: f32[16,8], index: 9, kind: output, shape index: {0}]   ;;  %s3005_s10 = inlined_call_operand.hbm [shape: s32[2,8], index: 10, kind: output, shape index: {1}]  }
   0x1   :  { %v38_v0 = vld [vmem:[%s2996_s1 + $0x8] sm:$0xff]  ;;  %v40_v1 = vld [vmem:[%s2996_s1 + $0x18] sm:$0xff]  ;;  %v37_v5 = vld [vmem:[%s2996_s1] sm:$0xff]  ;;  %128 = vmatprep.mubr.f32.mxu0 %v2376_v7  ;;  %225 = vmatprep.mubr.f32.mxu1 %v2376_v7 }
   0x2   :  { %v142_v2 = vld [vmem:[%s2998_s3 + $0x8] sm:$0xff]  ;;  %v2067_v3 = vpack.c.bf16 %v40_v1, %v38_v0  ;;  %v144_v4 = vld [vmem:[%s2998_s3 + $0x18] sm:$0xff]  ;;  %v39_v6 = vld [vmem:[%s2996_s1 + $0x10] sm:$0xff] }
   0x3   :  { %v2456_v8 = vpack.c.bf16 %v144_v4, %v142_v2  ;;  %v2069_v9 = vpack.c.bf16 %v39_v6, %v37_v5  ;;  %v141_v10 = vld [vmem:[%s2998_s3] sm:$0xff]  ;;  %v143_v11 = vld [vmem:[%s2998_s3 + $0x10] sm:$0xff]  ;;  %v42_v12 = vld [vmem:[%s2996_s1 + $0x28] sm:$0xff] }
   0x4   :  { %2068 = vmatprep.subr.bf16.mxu0 %v2067_v3  ;;  %v2467_v13 = vpack.c.bf16 %v143_v11, %v141_v10  ;;  %v44_v14 = vld [vmem:[%s2996_s1 + $0x38] sm:$0xff]  ;;  %v146_v15 = vld [vmem:[%s2998_s3 + $0x28] sm:$0xff]  ;;  %v41_v19 = vld [vmem:[%s2996_s1 + $0x20] sm:$0xff] }
   0x5   :  { %v148_v16 = vld [vmem:[%s2998_s3 + $0x38] sm:$0xff]  ;;  %2076 = vmatprep.subr.bf16.mxu1 %v2456_v8  ;;  %2070 = vmatpush1.bf16.msra.mxu0 %v2069_v9  ;;  %v2071_v17 = vpack.c.bf16 %v44_v14, %v42_v12  ;;  %v43_v20 = vld [vmem:[%s2996_s1 + $0x30] sm:$0xff]  ;;  %v145_v21 = vld [vmem:[%s2998_s3 + $0x20] sm:$0xff] }
   0x6   :  { %v2479_v18 = vpack.c.bf16 %v148_v16, %v146_v15  ;;  %2078 = vmatpush1.bf16.msra.mxu1 %v2467_v13  ;;  %v2073_v22 = vpack.c.bf16 %v43_v20, %v41_v19  ;;  %v147_v23 = vld [vmem:[%s2998_s3 + $0x30] sm:$0xff]  ;;  %v150_v24 = vld [vmem:[%s2998_s3 + $0x48] sm:$0xff]  ;;  %v152_v26 = vld [vmem:[%s2998_s3 + $0x58] sm:$0xff] }
   0x7   :  { %2072 = vmatprep.subr.bf16.mxu0 %v2071_v17  ;;  %v2498_v25 = vpack.c.bf16 %v147_v23, %v145_v21  ;;  %v149_v27 = vld [vmem:[%s2998_s3 + $0x40] sm:$0xff]  ;;  %v151_v28 = vld [vmem:[%s2998_s3 + $0x50] sm:$0xff]  ;;  %v2509_v29 = vpack.c.bf16 %v152_v26, %v150_v24  ;;  %v154_v30 = vld [vmem:[%s2998_s3 + $0x68] sm:$0xff] }
   0x8   :  { %2080 = vmatprep.subr.bf16.mxu1 %v2479_v18  ;;  %v156_v31 = vld [vmem:[%s2998_s3 + $0x78] sm:$0xff]  ;;  %v35_v32 = vld [vmem:[%s2995_s0] sm:$0xff]  ;;  %v2521_v33 = vpack.c.bf16 %v151_v28, %v149_v27 }
   0x9   :  { %2074 = vmatpush1.bf16.msra.mxu0 %v2073_v22 }
   0xa   :  { %2082 = vmatpush1.bf16.msra.mxu1 %v2498_v25  ;;  %2092 = vmatprep.subr.bf16.mxu0 %v2456_v8 }
   0xb   :  { %16 = vsyncpa [#allocation3], 0  ;;  %2084 = vmatprep.subr.bf16.mxu1 %v2509_v29  ;;  %v2525_v34 = vpack.c.bf16 %v156_v31, %v154_v30  ;;  %v153_v35 = vld [vmem:[%s2998_s3 + $0x60] sm:$0xff]  ;;  %v155_v36 = vld [vmem:[%s2998_s3 + $0x70] sm:$0xff]  ;;  %v47_v39 = vlaneseq  ;;  %s2378_s24 = smov 64   ;;  %s2379_s25 = smov 96  }
   0xc   :  { %2008 = vmatmul.mubr.msk.f32.vlgmr.msra.gmra.mrb[0].mxu0 %vm57_vm0, %v35_v32  ;;  %v36_v37 = vld [vmem:[%s2995_s0 + $0x8] sm:$0xff]  ;;  %v2540_v38 = vpack.c.bf16 %v155_v36, %v153_v35  ;;  %v45_v42 = vld [vmem:[%s2997_s2] sm:$0x3]  ;;  %s2377_s2 = smov 32   ;;  %vm157_vm1 = vcmask 523264   ;;  %vm1275_vm2 = vcmask 1041408  }
   0xd   :  { %134 = vmatprep.mubr.f32.mxu0 %v2376_v7  ;;  %2094 = vmatpush1.bf16.msra.mxu0 %v2467_v13  ;;  %v2565_v40 = vshrl.u32 %v47_v39, 7  ;;  %vm1277_vm3 = vcmask 1043456   ;;  %vm1279_vm4 = vcmask 1045504   ;;  %vm1380_vm5 = vcmask 64512  }
   0xe   :  { %2086 = vmatpush1.bf16.msra.mxu1 %v2521_v33  ;;  %2096 = vmatprep.subr.bf16.mxu0 %v2479_v18  ;;  %vm1829_vm12 = vcmask 1041409  }
   0xf   :  { %2088 = vmatprep.subr.bf16.mxu1 %v2525_v34  ;;  %v53_v41 = vsub.s32 1, %v2565_v40  ;;  %v2574_v44 = vsub.s32 0, %v2565_v40 }
  0x10   :  { %2009 = vmatmul.mubr.msk.f32.gmra.mrb[2].mxu0 %vm57_vm0, %v36_v37 }
  0x11   :  { %2098 = vmatpush1.bf16.msra.mxu0 %v2498_v25  ;;  %361 = vmatprep.mubr.f32.mxu0 %v2376_v7  ;;  %v54_v43 = vrot.slane %v45_v42, %v53_v41  ;;  %v50_v48 = vrot.slane %v45_v42, %v2574_v44 }
  0x12   :  { %2090 = vmatpush1.bf16.msra.mxu1 %v2540_v38  ;;  %2100 = vmatprep.subr.bf16.mxu0 %v2509_v29 }
  0x13   :  { %2108 = vmatprep.subr.bf16.mxu1 %v2456_v8 }
  0x15   :  { %226 = vmatmul.mubr.f32.vlgmr.msra.gmra.mrb[0].mxu1 %v2376_v7  ;;  %2102 = vmatpush1.bf16.msra.mxu0 %v2521_v33 }
  0x16   :  { %2104 = vmatprep.subr.bf16.mxu0 %v2525_v34  ;;  %2110 = vmatpush1.bf16.msra.mxu1 %v2467_v13 }
  0x17   :  { %2112 = vmatprep.subr.bf16.mxu1 %v2479_v18  ;;  %499 = vmatprep.mubr.f32.mxu1 %v2376_v7 }
  0x19   :  { %2106 = vmatpush1.bf16.msra.mxu0 %v2540_v38 }
  0x1a   :  { %2114 = vmatpush1.bf16.msra.mxu1 %v2498_v25  ;;  %2124 = vmatprep.subr.bf16.mxu0 %v2456_v8 }
  0x1b   :  { %2116 = vmatprep.subr.bf16.mxu1 %v2509_v29 }
  0x1e   :  { %2118 = vmatpush1.bf16.msra.mxu1 %v2521_v33 }
  0x1f   :  { %2120 = vmatprep.subr.bf16.mxu1 %v2525_v34 }
  0x22   :  { %2122 = vmatpush1.bf16.msra.mxu1 %v2540_v38 }
  0x23   :  { %2140 = vmatprep.subr.bf16.mxu1 %v2456_v8 }
  0xdf   :  { %v130_v45 = vpop.f32.mrb[0].mxu0 }
  0xe0   :  { %v132_v46 = vpop.f32.mrb[1].mxu0  ;;  %v2583_v53 = vadd.f32 %v130_v45, %v50_v48 }
  0xe1   :  { %v2576_v47 = vadd.f32 %v132_v46, %v54_v43 }
  0xe2   :  { %v369_v30 = vrot.slane %v2583_v53, 2 }
  0xe3   :  { %v136_v49 = vpop.f32.mrb[2].mxu0 }
  0xe4   :  { %v2579_v50 = vadd.f32 %v136_v49, %v50_v48  ;;  %v138_v51 = vpop.f32.mrb[3].mxu0 }
  0xe5   :  { %v2581_v52 = vadd.f32 %v138_v51, %v54_v43 }
  0xe7   :  { %v258_v54 = vrot.slane %v2581_v52, 6  ;;  %v396_v32 = vrot.slane %v2581_v52, 4 }
  0xe8   :  { %v227_v55 = vpop.f32.mrb[0].mxu1 }
  0xe9   :  { %v232_v56 = vadd.f32 %v227_v55, %v2583_v53  ;;  %v229_v57 = vpop.f32.mrb[1].mxu1 }
  0xea   :  { %v260_v58 = vadd.f32 %v258_v54, %v229_v57 }
  0xeb   :  { %2224 = vtanh.f32 %v232_v56  ;;  %v2010_v61 = vmul.f32 -1.442695, %v232_v56 }
  0xec   :  { %2226 = vtanh.f32 %v260_v58  ;;  %v2011_v62 = vmul.f32 -1.442695, %v260_v58 }
  0xed   :  { %2228 = vpow2.f32 %v2010_v61 }
  0xee   :  { %2230 = vpow2.f32 %v2011_v62 }
  0xf5   :  { %v2225_v59 = vpop.eup %2224 }
  0xf6   :  { %242 = vrot.lane.b32.xlu0 %v2225_v59, %s2377_s2  ;;  %v2227_v60 = vpop.eup %2226 }
  0xf7   :  { %v2229_v63 = vpop.eup %2228 }
  0xf8   :  { %v236_v0 = vadd.f32 1.0, %v2229_v63  ;;  %v2231_v1 = vpop.eup %2230 }
  0xf9   :  { %v264_v2 = vadd.f32 1.0, %v2231_v1 }
  0xfa   :  { %270 = vrot.lane.b32.xlu0 %v2227_v60, %s2377_s2  ;;  %2232 = vrcp.f32 %v236_v0 }
  0xfb   :  { %2234 = vrcp.f32 %v264_v2 }
 0x104   :  { %v2233_v3 = vpop.eup %2232 }
 0x105   :  { %v2235_v6 = vpop.eup %2234  ;;  %v240_v11 = vmul.f32 0.0, %v2233_v3 }
 0x106   :  { %v268_v15 = vmul.f32 0.0, %v2235_v6 }
 0x168   :  { %v243_v4 = vpop.permute.xlu0 %242 }
 0x169   :  { %v245_v5 = vmul.f32 %v2233_v3, %v243_v4 }
 0x16b   :  { %247 = vrot.lane.b32.xlu1 %v245_v5, %s2377_s2 }
 0x16c   :  { %v271_v9 = vpop.permute.xlu0 %270 }
 0x16d   :  { %v273_v10 = vmul.f32 %v2235_v6, %v271_v9 }
 0x16f   :  { %275 = vrot.lane.b32.xlu1 %v273_v10, %s2377_s2 }
 0x1dd   :  { %v248_v12 = vpop.permute.xlu1 %247 }
 0x1de   :  { %v250_v14 = vadd.f32 %v248_v12, %v240_v11 }
 0x1e0   :  { %2236 = vtanh.f32 %v250_v14 }
 0x1e1   :  { %v276_v16 = vpop.permute.xlu1 %275 }
 0x1e2   :  { %v278_v17 = vadd.f32 %v276_v16, %v268_v15  ;;  %v506_v15 = vrot.slane %v2583_v53, 4 }
 0x1e4   :  { %2238 = vtanh.f32 %v278_v17 }
 0x1ea   :  { %v2237_v19 = vpop.eup %2236 }
 0x1eb   :  { %253 = vrot.lane.b32.xlu0 %v2237_v19, %s2377_s2 }
 0x1ee   :  { %v2239_v20 = vpop.eup %2238 }
 0x1ef   :  { %281 = vrot.lane.b32.xlu1 %v2239_v20, %s2377_s2 }
 0x25d   :  { %v254_v21 = vpop.permute.xlu0 %253 }
 0x25e   :  { %v256_v22 = vmul.f32 %v2233_v3, %v254_v21 }
 0x260   :  { %286 = vrot.lane.b32.xlu0 %v256_v22, %s2378_s24 }
 0x261   :  { %v282_v23 = vpop.permute.xlu1 %281 }
 0x262   :  { %v284_v24 = vmul.f32 %v2235_v6, %v282_v23 }
 0x264   :  { %290 = vrot.lane.b32.xlu1 %v284_v24, %s2379_s25 }
 0x2d2   :  { %v2595_v26 = vpop.permute.xlu0 %286 }
 0x2d6   :  { %v2597_v27 = vpop.permute.xlu1 %290 }
 0x2d7   :  { %v293_v28 = vsel %vm57_vm0, %v2595_v26, %v2597_v27 }
 0x2d8   :  { %2012 = vmatmul.mubr.msk.f32.vlgmr.msra.gmra.mrb[4].mxu0 %vm157_vm1, %v293_v28 }
 0x2d9   :  { %2126 = vmatpush1.bf16.msra.mxu0 %v2467_v13  ;;  %636 = vmatprep.mubr.f32.mxu0 %v2376_v7 }
 0x2da   :  { %2128 = vmatprep.subr.bf16.mxu0 %v2479_v18 }
 0x2dd   :  { %2130 = vmatpush1.bf16.msra.mxu0 %v2498_v25 }
 0x2de   :  { %2132 = vmatprep.subr.bf16.mxu0 %v2509_v29 }
 0x2e1   :  { %2134 = vmatpush1.bf16.msra.mxu0 %v2521_v33 }
 0x2e2   :  { %2136 = vmatprep.subr.bf16.mxu0 %v2525_v34 }
 0x2e5   :  { %2138 = vmatpush1.bf16.msra.mxu0 %v2540_v38 }
 0x2e6   :  { %2156 = vmatprep.subr.bf16.mxu0 %v2456_v8 }
 0x3ab   :  { %v363_v31 = vpop.f32.mrb[4].mxu0 }
 0x3ac   :  { %v371_v35 = vadd.f32 %v369_v30, %v363_v31  ;;  %v365_v36 = vpop.f32.mrb[5].mxu0 }
 0x3ad   :  { %v398_v37 = vadd.f32 %v396_v32, %v365_v36 }
 0x3ae   :  { %2240 = vtanh.f32 %v371_v35  ;;  %v2013_v45 = vmul.f32 -1.442695, %v371_v35 }
 0x3af   :  { %2242 = vtanh.f32 %v398_v37  ;;  %v2014_v46 = vmul.f32 -1.442695, %v398_v37 }
 0x3b0   :  { %2244 = vpow2.f32 %v2013_v45 }
 0x3b1   :  { %2246 = vpow2.f32 %v2014_v46 }
 0x3b8   :  { %v2241_v42 = vpop.eup %2240 }
 0x3b9   :  { %v2243_v43 = vpop.eup %2242  ;;  %381 = vrot.lane.b32.xlu0 %v2241_v42, %s2377_s2 }
 0x3ba   :  { %408 = vrot.lane.b32.xlu1 %v2243_v43, %s2377_s2  ;;  %v2245_v48 = vpop.eup %2244 }
 0x3bb   :  { %v2247_v49 = vpop.eup %2246  ;;  %v375_v51 = vadd.f32 1.0, %v2245_v48 }
 0x3bc   :  { %v402_v54 = vadd.f32 1.0, %v2247_v49 }
 0x3bd   :  { %2248 = vrcp.f32 %v375_v51 }
 0x3be   :  { %2250 = vrcp.f32 %v402_v54 }
 0x3c7   :  { %v2249_v55 = vpop.eup %2248 }
 0x3c8   :  { %v2251_v57 = vpop.eup %2250  ;;  %v379_v61 = vmul.f32 %v2249_v55, %v250_v14 }
 0x3c9   :  { %v406_v63 = vmul.f32 %v2251_v57, %v278_v17  ;;  %v533_v17 = vrot.slane %v2581_v52, 2 }
 0x42b   :  { %v382_v56 = vpop.permute.xlu0 %381 }
 0x42c   :  { %v384_v58 = vmul.f32 %v2249_v55, %v382_v56  ;;  %v409_v59 = vpop.permute.xlu1 %408 }
 0x42d   :  { %v411_v60 = vmul.f32 %v2251_v57, %v409_v59 }
 0x42e   :  { %386 = vrot.lane.b32.xlu0 %v384_v58, %s2377_s2 }
 0x42f   :  { %413 = vrot.lane.b32.xlu1 %v411_v60, %s2377_s2 }
 0x4a0   :  { %v387_v62 = vpop.permute.xlu0 %386 }
 0x4a1   :  { %v389_v0 = vadd.f32 %v387_v62, %v379_v61  ;;  %v414_v1 = vpop.permute.xlu1 %413 }
 0x4a2   :  { %v416_v2 = vadd.f32 %v414_v1, %v406_v63 }
 0x4a3   :  { %2252 = vtanh.f32 %v389_v0 }
 0x4a4   :  { %2254 = vtanh.f32 %v416_v2 }
 0x4ad   :  { %v2253_v3 = vpop.eup %2252 }
 0x4ae   :  { %v2255_v4 = vpop.eup %2254  ;;  %392 = vrot.lane.b32.xlu0 %v2253_v3, %s2377_s2 }
 0x4af   :  { %419 = vrot.lane.b32.xlu1 %v2255_v4, %s2377_s2 }
 0x520   :  { %v393_v5 = vpop.permute.xlu0 %392 }
 0x521   :  { %v395_v6 = vmul.f32 %v2249_v55, %v393_v5  ;;  %v420_v9 = vpop.permute.xlu1 %419 }
 0x522   :  { %v422_v10 = vmul.f32 %v2251_v57, %v420_v9 }
 0x523   :  { %424 = vrot.lane.b32.xlu0 %v395_v6, %s2378_s24 }
 0x524   :  { %428 = vrot.lane.b32.xlu1 %v422_v10, %s2379_s25 }
 0x595   :  { %v2622_v11 = vpop.permute.xlu0 %424 }
 0x596   :  { %v2624_v12 = vpop.permute.xlu1 %428 }
 0x597   :  { %v431_v14 = vsel %vm57_vm0, %v2622_v11, %v2624_v12 }
 0x598   :  { %2015 = vmatmul.mubr.msk.f32.vlgmr.msra.gmra.mrb[2].mxu1 %vm157_vm1, %v431_v14 }
 0x599   :  { %2142 = vmatpush1.bf16.msra.mxu1 %v2467_v13  ;;  %771 = vmatprep.mubr.f32.mxu1 %v2376_v7 }
 0x59a   :  { %2144 = vmatprep.subr.bf16.mxu1 %v2479_v18 }
 0x59d   :  { %2146 = vmatpush1.bf16.msra.mxu1 %v2498_v25 }
 0x59e   :  { %2148 = vmatprep.subr.bf16.mxu1 %v2509_v29 }
 0x5a1   :  { %2150 = vmatpush1.bf16.msra.mxu1 %v2521_v33 }
 0x5a2   :  { %2152 = vmatprep.subr.bf16.mxu1 %v2525_v34 }
 0x5a5   :  { %2154 = vmatpush1.bf16.msra.mxu1 %v2540_v38 }
 0x5a6   :  { %2172 = vmatprep.subr.bf16.mxu1 %v2456_v8 }
 0x66b   :  { %v501_v16 = vpop.f32.mrb[2].mxu1 }
 0x66c   :  { %v508_v19 = vadd.f32 %v506_v15, %v501_v16  ;;  %v503_v20 = vpop.f32.mrb[3].mxu1 }
 0x66d   :  { %v535_v21 = vadd.f32 %v533_v17, %v503_v20 }
 0x66e   :  { %2256 = vtanh.f32 %v508_v19  ;;  %v2016_v24 = vmul.f32 -1.442695, %v508_v19 }
 0x66f   :  { %2258 = vtanh.f32 %v535_v21  ;;  %v2017_v28 = vmul.f32 -1.442695, %v535_v21 }
 0x670   :  { %2260 = vpow2.f32 %v2016_v24 }
 0x671   :  { %2262 = vpow2.f32 %v2017_v28 }
 0x678   :  { %v2257_v22 = vpop.eup %2256 }
 0x679   :  { %v2259_v23 = vpop.eup %2258  ;;  %518 = vrot.lane.b32.xlu0 %v2257_v22, %s2377_s2 }
 0x67a   :  { %545 = vrot.lane.b32.xlu1 %v2259_v23, %s2377_s2  ;;  %v2261_v30 = vpop.eup %2260 }
 0x67b   :  { %v2263_v31 = vpop.eup %2262  ;;  %v512_v32 = vadd.f32 1.0, %v2261_v30 }
 0x67c   :  { %v539_v35 = vadd.f32 1.0, %v2263_v31 }
 0x67d   :  { %2264 = vrcp.f32 %v512_v32 }
 0x67e   :  { %2266 = vrcp.f32 %v539_v35 }
 0x687   :  { %v2265_v36 = vpop.eup %2264 }
 0x688   :  { %v2267_v42 = vpop.eup %2266  ;;  %v516_v48 = vmul.f32 %v2265_v36, %v389_v0 }
 0x689   :  { %v543_v51 = vmul.f32 %v2267_v42, %v416_v2  ;;  %v643_v2 = vrot.slane %v2583_v53, 6 }
 0x6eb   :  { %v519_v37 = vpop.permute.xlu0 %518 }
 0x6ec   :  { %v521_v43 = vmul.f32 %v2265_v36, %v519_v37  ;;  %v546_v45 = vpop.permute.xlu1 %545 }
 0x6ed   :  { %v548_v46 = vmul.f32 %v2267_v42, %v546_v45 }
 0x6ee   :  { %523 = vrot.lane.b32.xlu0 %v521_v43, %s2377_s2 }
 0x6ef   :  { %550 = vrot.lane.b32.xlu1 %v548_v46, %s2377_s2 }
 0x760   :  { %v524_v49 = vpop.permute.xlu0 %523 }
 0x761   :  { %v526_v54 = vadd.f32 %v524_v49, %v516_v48  ;;  %v551_v55 = vpop.permute.xlu1 %550 }
 0x762   :  { %v553_v56 = vadd.f32 %v551_v55, %v543_v51  ;;  %v804_v55 = vrot.slane %v2576_v47, 6 }
 0x763   :  { %2268 = vtanh.f32 %v526_v54 }
 0x764   :  { %2270 = vtanh.f32 %v553_v56 }
 0x76d   :  { %v2269_v57 = vpop.eup %2268 }
 0x76e   :  { %v2271_v58 = vpop.eup %2270  ;;  %529 = vrot.lane.b32.xlu0 %v2269_v57, %s2377_s2 }
 0x76f   :  { %556 = vrot.lane.b32.xlu1 %v2271_v58, %s2377_s2 }
 0x7e0   :  { %v530_v59 = vpop.permute.xlu0 %529 }
 0x7e1   :  { %v532_v60 = vmul.f32 %v2265_v36, %v530_v59  ;;  %v557_v61 = vpop.permute.xlu1 %556 }
 0x7e2   :  { %v559_v62 = vmul.f32 %v2267_v42, %v557_v61 }
 0x7e3   :  { %561 = vrot.lane.b32.xlu0 %v532_v60, %s2378_s24 }
 0x7e4   :  { %565 = vrot.lane.b32.xlu1 %v559_v62, %s2379_s25 }
 0x855   :  { %v2649_v63 = vpop.permute.xlu0 %561 }
 0x856   :  { %v2651_v0 = vpop.permute.xlu1 %565 }
 0x857   :  { %v568_v1 = vsel %vm57_vm0, %v2649_v63, %v2651_v0 }
 0x858   :  { %2018 = vmatmul.mubr.msk.f32.vlgmr.msra.gmra.mrb[6].mxu0 %vm157_vm1, %v568_v1 }
 0x859   :  { %2158 = vmatpush1.bf16.msra.mxu0 %v2467_v13  ;;  %907 = vmatprep.mubr.f32.mxu0 %v2376_v7 }
 0x85a   :  { %2160 = vmatprep.subr.bf16.mxu0 %v2479_v18 }
 0x85d   :  { %2162 = vmatpush1.bf16.msra.mxu0 %v2498_v25 }
 0x85e   :  { %2164 = vmatprep.subr.bf16.mxu0 %v2509_v29 }
 0x861   :  { %2166 = vmatpush1.bf16.msra.mxu0 %v2521_v33 }
 0x862   :  { %2168 = vmatprep.subr.bf16.mxu0 %v2525_v34 }
 0x865   :  { %2170 = vmatpush1.bf16.msra.mxu0 %v2540_v38 }
 0x866   :  { %2188 = vmatprep.subr.bf16.mxu0 %v2456_v8 }
 0x92b   :  { %v638_v3 = vpop.f32.mrb[6].mxu0 }
 0x92c   :  { %v645_v4 = vadd.f32 %v643_v2, %v638_v3  ;;  %v640_v5 = vpop.f32.mrb[7].mxu0 }
 0x92d   :  { %v670_v6 = vadd.f32 %v640_v5, %v2581_v52 }
 0x92e   :  { %2272 = vtanh.f32 %v645_v4  ;;  %v2019_v14 = vmul.f32 -1.442695, %v645_v4 }
 0x92f   :  { %2274 = vtanh.f32 %v670_v6  ;;  %v2020_v15 = vmul.f32 -1.442695, %v670_v6 }
 0x930   :  { %2276 = vpow2.f32 %v2019_v14 }
 0x931   :  { %2278 = vpow2.f32 %v2020_v15 }
 0x938   :  { %v2273_v9 = vpop.eup %2272 }
 0x939   :  { %v2275_v10 = vpop.eup %2274  ;;  %655 = vrot.lane.b32.xlu0 %v2273_v9, %s2377_s2 }
 0x93a   :  { %680 = vrot.lane.b32.xlu1 %v2275_v10, %s2377_s2  ;;  %v2277_v8 = vpop.eup %2276 }
 0x93b   :  { %v2279_v16 = vpop.eup %2278  ;;  %v649_v53 = vadd.f32 1.0, %v2277_v8 }
 0x93c   :  { %v674_v17 = vadd.f32 1.0, %v2279_v16 }
 0x93d   :  { %2280 = vrcp.f32 %v649_v53 }
 0x93e   :  { %2282 = vrcp.f32 %v674_v17 }
 0x947   :  { %v2281_v19 = vpop.eup %2280 }
 0x948   :  { %v2283_v20 = vpop.eup %2282  ;;  %v653_v24 = vmul.f32 %v2281_v19, %v526_v54 }
 0x949   :  { %v678_v30 = vmul.f32 %v2283_v20, %v553_v56 }
 0x9ab   :  { %v656_v52 = vpop.permute.xlu0 %655 }
 0x9ac   :  { %v658_v21 = vmul.f32 %v2281_v19, %v656_v52  ;;  %v681_v22 = vpop.permute.xlu1 %680 }
 0x9ad   :  { %v683_v23 = vmul.f32 %v2283_v20, %v681_v22 }
 0x9ae   :  { %660 = vrot.lane.b32.xlu0 %v658_v21, %s2377_s2 }
 0x9af   :  { %685 = vrot.lane.b32.xlu1 %v683_v23, %s2377_s2 }
 0xa20   :  { %v661_v28 = vpop.permute.xlu0 %660 }
 0xa21   :  { %v663_v31 = vadd.f32 %v661_v28, %v653_v24  ;;  %v686_v32 = vpop.permute.xlu1 %685 }
 0xa22   :  { %v688_v35 = vadd.f32 %v686_v32, %v678_v30 }
 0xa23   :  { %2284 = vtanh.f32 %v663_v31 }
 0xa24   :  { %2286 = vtanh.f32 %v688_v35 }
 0xa2d   :  { %v2285_v36 = vpop.eup %2284 }
 0xa2e   :  { %v2287_v37 = vpop.eup %2286  ;;  %666 = vrot.lane.b32.xlu0 %v2285_v36, %s2377_s2 }
 0xa2f   :  { %691 = vrot.lane.b32.xlu1 %v2287_v37, %s2377_s2  ;;  %v942_v37 = vrot.slane %v2576_v47, 4 }
 0xaa0   :  { %v667_v42 = vpop.permute.xlu0 %666 }
 0xaa1   :  { %v669_v43 = vmul.f32 %v2281_v19, %v667_v42  ;;  %v692_v45 = vpop.permute.xlu1 %691 }
 0xaa2   :  { %v694_v46 = vmul.f32 %v2283_v20, %v692_v45 }
 0xaa3   :  { %696 = vrot.lane.b32.xlu0 %v669_v43, %s2378_s24 }
 0xaa4   :  { %700 = vrot.lane.b32.xlu1 %v694_v46, %s2379_s25 }
 0xb15   :  { %v2676_v48 = vpop.permute.xlu0 %696 }
 0xb16   :  { %v2678_v49 = vpop.permute.xlu1 %700 }
 0xb17   :  { %v703_v51 = vsel %vm57_vm0, %v2676_v48, %v2678_v49 }
 0xb18   :  { %2021 = vmatmul.mubr.msk.f32.vlgmr.msra.gmra.mrb[4].mxu1 %vm157_vm1, %v703_v51 }
 0xb19   :  { %2174 = vmatpush1.bf16.msra.mxu1 %v2467_v13  ;;  %1045 = vmatprep.mubr.f32.mxu1 %v2376_v7 }
 0xb1a   :  { %2176 = vmatprep.subr.bf16.mxu1 %v2479_v18 }
 0xb1d   :  { %2178 = vmatpush1.bf16.msra.mxu1 %v2498_v25 }
 0xb1e   :  { %2180 = vmatprep.subr.bf16.mxu1 %v2509_v29 }
 0xb21   :  { %2182 = vmatpush1.bf16.msra.mxu1 %v2521_v33 }
 0xb22   :  { %2184 = vmatprep.subr.bf16.mxu1 %v2525_v34 }
 0xb25   :  { %2186 = vmatpush1.bf16.msra.mxu1 %v2540_v38 }
 0xbeb   :  { %v773_v54 = vpop.f32.mrb[4].mxu1 }
 0xbec   :  { %v778_v56 = vadd.f32 %v773_v54, %v2579_v50  ;;  %v775_v57 = vpop.f32.mrb[5].mxu1 }
 0xbed   :  { %v806_v58 = vadd.f32 %v804_v55, %v775_v57 }
 0xbee   :  { %2288 = vtanh.f32 %v778_v56  ;;  %v2022_v61 = vmul.f32 -1.442695, %v778_v56 }
 0xbef   :  { %2290 = vtanh.f32 %v806_v58  ;;  %v2023_v62 = vmul.f32 -1.442695, %v806_v58 }
 0xbf0   :  { %2292 = vpow2.f32 %v2022_v61 }
 0xbf1   :  { %2294 = vpow2.f32 %v2023_v62 }
 0xbf8   :  { %v2289_v59 = vpop.eup %2288 }
 0xbf9   :  { %v2291_v60 = vpop.eup %2290  ;;  %788 = vrot.lane.b32.xlu0 %v2289_v59, %s2377_s2 }
 0xbfa   :  { %816 = vrot.lane.b32.xlu1 %v2291_v60, %s2377_s2  ;;  %v2293_v1 = vpop.eup %2292 }
 0xbfb   :  { %v2295_v2 = vpop.eup %2294  ;;  %v782_v3 = vadd.f32 1.0, %v2293_v1 }
 0xbfc   :  { %v810_v4 = vadd.f32 1.0, %v2295_v2 }
 0xbfd   :  { %2296 = vrcp.f32 %v782_v3 }
 0xbfe   :  { %2298 = vrcp.f32 %v810_v4 }
 0xc07   :  { %v2297_v5 = vpop.eup %2296 }
 0xc08   :  { %v2299_v9 = vpop.eup %2298  ;;  %v786_v8 = vmul.f32 %v2297_v5, %v663_v31 }
 0xc09   :  { %v814_v53 = vmul.f32 %v2299_v9, %v688_v35  ;;  %v915_v35 = vrot.slane %v2579_v50, 2 }
 0xc6b   :  { %v789_v6 = vpop.permute.xlu0 %788 }
 0xc6c   :  { %v791_v10 = vmul.f32 %v2297_v5, %v789_v6  ;;  %v817_v14 = vpop.permute.xlu1 %816 }
 0xc6d   :  { %v819_v15 = vmul.f32 %v2299_v9, %v817_v14 }
 0xc6e   :  { %793 = vrot.lane.b32.xlu0 %v791_v10, %s2377_s2 }
 0xc6f   :  { %821 = vrot.lane.b32.xlu1 %v819_v15, %s2377_s2 }
 0xce0   :  { %v794_v16 = vpop.permute.xlu0 %793 }
 0xce1   :  { %v796_v17 = vadd.f32 %v794_v16, %v786_v8  ;;  %v822_v19 = vpop.permute.xlu1 %821  ;;  %v1052_v8 = vrot.slane %v2579_v50, 4 }
 0xce2   :  { %v824_v52 = vadd.f32 %v822_v19, %v814_v53  ;;  %v1079_v53 = vrot.slane %v2576_v47, 2 }
 0xce3   :  { %2300 = vtanh.f32 %v796_v17 }
 0xce4   :  { %2302 = vtanh.f32 %v824_v52 }
 0xced   :  { %v2301_v20 = vpop.eup %2300 }
 0xcee   :  { %v2303_v21 = vpop.eup %2302  ;;  %799 = vrot.lane.b32.xlu0 %v2301_v20, %s2377_s2 }
 0xcef   :  { %827 = vrot.lane.b32.xlu1 %v2303_v21, %s2377_s2 }
 0xd60   :  { %v800_v22 = vpop.permute.xlu0 %799 }
 0xd61   :  { %v802_v23 = vmul.f32 %v2297_v5, %v800_v22  ;;  %v828_v24 = vpop.permute.xlu1 %827 }
 0xd62   :  { %v830_v28 = vmul.f32 %v2299_v9, %v828_v24 }
 0xd63   :  { %832 = vrot.lane.b32.xlu0 %v802_v23, %s2378_s24 }
 0xd64   :  { %836 = vrot.lane.b32.xlu1 %v830_v28, %s2379_s25 }
 0xdd5   :  { %v2702_v30 = vpop.permute.xlu0 %832 }
 0xdd6   :  { %v2704_v31 = vpop.permute.xlu1 %836 }
 0xdd7   :  { %v839_v32 = vsel %vm57_vm0, %v2702_v30, %v2704_v31 }
 0xdd8   :  { %2024 = vmatmul.mubr.msk.f32.vlgmr.msra.gmra.mrb[8].mxu0 %vm157_vm1, %v839_v32 }
 0xdd9   :  { %2190 = vmatpush1.bf16.msra.mxu0 %v2467_v13  ;;  %1182 = vmatprep.mubr.f32.mxu0 %v2376_v7 }
 0xdda   :  { %2192 = vmatprep.subr.bf16.mxu0 %v2479_v18 }
 0xddd   :  { %2194 = vmatpush1.bf16.msra.mxu0 %v2498_v25 }
 0xdde   :  { %2196 = vmatprep.subr.bf16.mxu0 %v2509_v29 }
 0xde1   :  { %2198 = vmatpush1.bf16.msra.mxu0 %v2521_v33 }
 0xde2   :  { %2200 = vmatprep.subr.bf16.mxu0 %v2525_v34 }
 0xde5   :  { %2202 = vmatpush1.bf16.msra.mxu0 %v2540_v38 }
 0xeab   :  { %v909_v36 = vpop.f32.mrb[8].mxu0 }
 0xeac   :  { %v917_v13 = vadd.f32 %v915_v35, %v909_v36  ;;  %v911_v42 = vpop.f32.mrb[9].mxu0 }
 0xead   :  { %v944_v7 = vadd.f32 %v942_v37, %v911_v42 }
 0xeae   :  { %2304 = vtanh.f32 %v917_v13  ;;  %v2025_v29 = vmul.f32 -1.442695, %v917_v13 }
 0xeaf   :  { %2306 = vtanh.f32 %v944_v7  ;;  %v2026_v33 = vmul.f32 -1.442695, %v944_v7 }
 0xeb0   :  { %2308 = vpow2.f32 %v2025_v29 }
 0xeb1   :  { %2310 = vpow2.f32 %v2026_v33 }
 0xeb8   :  { %v2305_v18 = vpop.eup %2304 }
 0xeb9   :  { %v2307_v25 = vpop.eup %2306  ;;  %927 = vrot.lane.b32.xlu0 %v2305_v18, %s2377_s2 }
 0xeba   :  { %954 = vrot.lane.b32.xlu1 %v2307_v25, %s2377_s2  ;;  %v2309_v34 = vpop.eup %2308 }
 0xebb   :  { %v2311_v38 = vpop.eup %2310  ;;  %v921_v43 = vadd.f32 1.0, %v2309_v34 }
 0xebc   :  { %v948_v45 = vadd.f32 1.0, %v2311_v38 }
 0xebd   :  { %2312 = vrcp.f32 %v921_v43 }
 0xebe   :  { %2314 = vrcp.f32 %v948_v45 }
 0xec7   :  { %v2313_v46 = vpop.eup %2312 }
 0xec8   :  { %v2315_v54 = vpop.eup %2314  ;;  %v925_v58 = vmul.f32 %v2313_v46, %v796_v17 }
 0xec9   :  { %v952_v60 = vmul.f32 %v2315_v54, %v824_v52 }
 0xf2b   :  { %v928_v51 = vpop.permute.xlu0 %927 }
 0xf2c   :  { %v930_v55 = vmul.f32 %v2313_v46, %v928_v51  ;;  %v955_v56 = vpop.permute.xlu1 %954 }
 0xf2d   :  { %v957_v57 = vmul.f32 %v2315_v54, %v955_v56 }
 0xf2e   :  { %932 = vrot.lane.b32.xlu0 %v930_v55, %s2377_s2 }
 0xf2f   :  { %959 = vrot.lane.b32.xlu1 %v957_v57, %s2377_s2 }
 0xfa0   :  { %v933_v59 = vpop.permute.xlu0 %932 }
 0xfa1   :  { %v935_v61 = vadd.f32 %v933_v59, %v925_v58  ;;  %v960_v62 = vpop.permute.xlu1 %959 }
 0xfa2   :  { %v962_v1 = vadd.f32 %v960_v62, %v952_v60  ;;  %v1189_v60 = vrot.slane %v2579_v50, 6 }
 0xfa3   :  { %2316 = vtanh.f32 %v935_v61 }
 0xfa4   :  { %2318 = vtanh.f32 %v962_v1 }
 0xfad   :  { %v2317_v2 = vpop.eup %2316 }
 0xfae   :  { %v2319_v3 = vpop.eup %2318  ;;  %938 = vrot.lane.b32.xlu0 %v2317_v2, %s2377_s2 }
 0xfaf   :  { %965 = vrot.lane.b32.xlu1 %v2319_v3, %s2377_s2 }
0x1020   :  { %v939_v4 = vpop.permute.xlu0 %938 }
0x1021   :  { %v941_v5 = vmul.f32 %v2313_v46, %v939_v4  ;;  %v966_v6 = vpop.permute.xlu1 %965 }
0x1022   :  { %v968_v9 = vmul.f32 %v2315_v54, %v966_v6 }
0x1023   :  { %970 = vrot.lane.b32.xlu0 %v941_v5, %s2378_s24 }
0x1024   :  { %974 = vrot.lane.b32.xlu1 %v968_v9, %s2379_s25 }
0x1095   :  { %v2728_v10 = vpop.permute.xlu0 %970 }
0x1096   :  { %v2730_v14 = vpop.permute.xlu1 %974 }
0x1097   :  { %v977_v15 = vsel %vm57_vm0, %v2728_v10, %v2730_v14 }
0x1098   :  { %2027 = vmatmul.mubr.msk.f32.vlgmr.msra.gmra.mrb[6].mxu1 %vm157_vm1, %v977_v15 }
0x116b   :  { %v1047_v16 = vpop.f32.mrb[6].mxu1 }
0x116c   :  { %v1054_v17 = vadd.f32 %v1052_v8, %v1047_v16  ;;  %v1049_v19 = vpop.f32.mrb[7].mxu1 }
0x116d   :  { %v1081_v52 = vadd.f32 %v1079_v53, %v1049_v19 }
0x116e   :  { %2320 = vtanh.f32 %v1054_v17  ;;  %v2028_v22 = vmul.f32 -1.442695, %v1054_v17 }
0x116f   :  { %2322 = vtanh.f32 %v1081_v52  ;;  %v2029_v23 = vmul.f32 -1.442695, %v1081_v52 }
0x1170   :  { %2324 = vpow2.f32 %v2028_v22 }
0x1171   :  { %2326 = vpow2.f32 %v2029_v23 }
0x1178   :  { %v2321_v20 = vpop.eup %2320 }
0x1179   :  { %v2323_v21 = vpop.eup %2322  ;;  %1064 = vrot.lane.b32.xlu0 %v2321_v20, %s2377_s2 }
0x117a   :  { %1091 = vrot.lane.b32.xlu1 %v2323_v21, %s2377_s2  ;;  %v2325_v24 = vpop.eup %2324 }
0x117b   :  { %v2327_v28 = vpop.eup %2326  ;;  %v1058_v32 = vadd.f32 1.0, %v2325_v24 }
0x117c   :  { %v1085_v35 = vadd.f32 1.0, %v2327_v28 }
0x117d   :  { %2328 = vrcp.f32 %v1058_v32  ;;  %v1284_v32 = vld [vmem:[%s2999_s4] sm:$0xff] }
0x117e   :  { %2330 = vrcp.f32 %v1085_v35  ;;  %v1285_v35 = vld [vmem:[%s2999_s4 + $0x8] sm:$0xff] }
0x1187   :  { %v2329_v36 = vpop.eup %2328 }
0x1188   :  { %v2331_v13 = vpop.eup %2330  ;;  %v1062_v25 = vmul.f32 %v2329_v36, %v935_v61 }
0x1189   :  { %v1089_v33 = vmul.f32 %v2331_v13, %v962_v1 }
0x11eb   :  { %v1065_v37 = vpop.permute.xlu0 %1064 }
0x11ec   :  { %v1067_v42 = vmul.f32 %v2329_v36, %v1065_v37  ;;  %v1092_v7 = vpop.permute.xlu1 %1091  ;;  %v2203_v37 = vpack.c.bf16 %v1285_v35, %v1284_v32 }
0x11ed   :  { %v1094_v18 = vmul.f32 %v2331_v13, %v1092_v7  ;;  %v1288_v7 = vld [vmem:[%s2999_s4 + $0x20] sm:$0xff] }
0x11ee   :  { %1069 = vrot.lane.b32.xlu0 %v1067_v42, %s2377_s2  ;;  %2204 = vmatprep.subr.bf16.mxu1 %v2203_v37 }
0x11ef   :  { %1096 = vrot.lane.b32.xlu1 %v1094_v18, %s2377_s2  ;;  %v1289_v18 = vld [vmem:[%s2999_s4 + $0x28] sm:$0xff]  ;;  %2206 = vmatpush3.bf16.msra.mxu1 %v2203_v37 }
0x1260   :  { %v1070_v29 = vpop.permute.xlu0 %1069 }
0x1261   :  { %v1072_v34 = vadd.f32 %v1070_v29, %v1062_v25  ;;  %v1097_v38 = vpop.permute.xlu1 %1096  ;;  %v2211_v25 = vpack.c.bf16 %v1289_v18, %v1288_v7 }
0x1262   :  { %v1099_v43 = vadd.f32 %v1097_v38, %v1089_v33  ;;  %v1291_v38 = vld [vmem:[%s2999_s4 + $0x38] sm:$0xff] }
0x1263   :  { %2332 = vtanh.f32 %v1072_v34 }
0x1264   :  { %2334 = vtanh.f32 %v1099_v43 }
0x126d   :  { %v2333_v45 = vpop.eup %2332 }
0x126e   :  { %v2335_v46 = vpop.eup %2334  ;;  %1075 = vrot.lane.b32.xlu0 %v2333_v45, %s2377_s2 }
0x126f   :  { %1102 = vrot.lane.b32.xlu1 %v2335_v46, %s2377_s2 }
0x12e0   :  { %v1076_v51 = vpop.permute.xlu0 %1075 }
0x12e1   :  { %v1078_v54 = vmul.f32 %v2329_v36, %v1076_v51  ;;  %v1103_v55 = vpop.permute.xlu1 %1102  ;;  %v1286_v36 = vld [vmem:[%s2999_s4 + $0x10] sm:$0xff] }
0x12e2   :  { %v1105_v56 = vmul.f32 %v2331_v13, %v1103_v55  ;;  %v1287_v13 = vld [vmem:[%s2999_s4 + $0x18] sm:$0xff]  ;;  %v1250_v55 = vsel %vm57_vm0, %v2728_v10, %v2651_v0 }
0x12e3   :  { %1107 = vrot.lane.b32.xlu0 %v1078_v54, %s2378_s24  ;;  %v2207_v42 = vpack.c.bf16 %v1287_v13, %v1286_v36 }
0x12e4   :  { %1111 = vrot.lane.b32.xlu1 %v1105_v56, %s2379_s25  ;;  %v1247_v56 = vsel %vm57_vm0, %v2649_v63, %v2730_v14 }
0x12e5   :  { %2208 = vmatprep.subr.bf16.mxu1 %v2207_v42  ;;  %v1261_v0 = vrot.slane %v1247_v56, 4 }
0x12e6   :  { %2210 = vmatpush3.bf16.msra.mxu1 %v2207_v42 }
0x12e7   :  { %2212 = vmatprep.subr.bf16.mxu1 %v2211_v25 }
0x12ea   :  { %2214 = vmatpush3.bf16.msra.mxu1 %v2211_v25 }
0x1355   :  { %v2746_v57 = vpop.permute.xlu0 %1107 }
0x1356   :  { %v2748_v58 = vpop.permute.xlu1 %1111 }
0x1357   :  { %v1114_v59 = vsel %vm57_vm0, %v2746_v57, %v2748_v58 }
0x1358   :  { %2030 = vmatmul.mubr.msk.f32.vlgmr.msra.gmra.mrb[10].mxu0 %vm157_vm1, %v1114_v59  ;;  %v1251_v59 = vsel %vm57_vm0, %v2746_v57, %v2624_v12 }
0x1359   :  { %v1270_v10 = vrot.slane %v1251_v59, 4 }
0x142b   :  { %v1184_v61 = vpop.f32.mrb[10].mxu0 }
0x142c   :  { %v1191_v62 = vadd.f32 %v1189_v60, %v1184_v61  ;;  %v1186_v1 = vpop.f32.mrb[11].mxu0  ;;  %v1246_v60 = vsel %vm57_vm0, %v2622_v11, %v2748_v58  ;;  %v1248_v61 = vsel %vm57_vm0, %v2676_v48, %v2704_v31  ;;  %v1249_v11 = vsel %vm57_vm0, %v2702_v30, %v2678_v49  ;;  %v2036_v30 = vld [vmem:[%s3001_s6] ss:$0 sm:$0xff] }
0x142d   :  { %v1216_v2 = vadd.f32 %v1186_v1, %v2576_v47  ;;  %v1264_v48 = vrot.slane %v1248_v61, 2 }
0x142e   :  { %2336 = vtanh.f32 %v1191_v62  ;;  %v2031_v5 = vmul.f32 -1.442695, %v1191_v62  ;;  %v1267_v62 = vrot.slane %v1250_v55, 6 }
0x142f   :  { %2338 = vtanh.f32 %v1216_v2  ;;  %v2032_v6 = vmul.f32 -1.442695, %v1216_v2  ;;  %v1258_v2 = vrot.slane %v1246_v60, 6 }
0x1430   :  { %2340 = vpow2.f32 %v2031_v5  ;;  %v1281_v57 = vsel %vm1275_vm2, %v1249_v11, %v1267_v62 }
0x1431   :  { %2342 = vpow2.f32 %v2032_v6  ;;  %v1282_v5 = vsel %vm1277_vm3, %v1281_v57, %v1270_v10 }
0x1438   :  { %v2337_v3 = vpop.eup %2336 }
0x1439   :  { %v2339_v4 = vpop.eup %2338  ;;  %1201 = vrot.lane.b32.xlu1 %v2337_v3, %s2377_s2 }
0x143a   :  { %1226 = vrot.lane.b32.xlu0 %v2339_v4, %s2377_s2  ;;  %v2341_v9 = vpop.eup %2340 }
0x143b   :  { %v2343_v15 = vpop.eup %2342  ;;  %v1195_v50 = vadd.f32 1.0, %v2341_v9 }
0x143c   :  { %v1220_v8 = vadd.f32 1.0, %v2343_v15 }
0x143d   :  { %2344 = vrcp.f32 %v1195_v50 }
0x143e   :  { %2346 = vrcp.f32 %v1220_v8 }
0x1447   :  { %v2345_v16 = vpop.eup %2344 }
0x1448   :  { %v2347_v53 = vpop.eup %2346  ;;  %v1199_v20 = vmul.f32 %v2345_v16, %v1072_v34  ;;  %v1290_v34 = vld [vmem:[%s2999_s4 + $0x30] sm:$0xff] }
0x1449   :  { %v1224_v22 = vmul.f32 %v2347_v53, %v1099_v43  ;;  %v2215_v43 = vpack.c.bf16 %v1291_v38, %v1290_v34 }
0x144b   :  { %2216 = vmatprep.subr.bf16.mxu1 %v2215_v43 }
0x144c   :  { %2218 = vmatpush3.bf16.msra.mxu1 %v2215_v43 }
0x14ab   :  { %v1202_v47 = vpop.permute.xlu1 %1201 }
0x14ac   :  { %v1204_v17 = vmul.f32 %v2345_v16, %v1202_v47  ;;  %v1227_v19 = vpop.permute.xlu0 %1226  ;;  %v2839_v47 = vld [vmem:[%s3003_s8] sm:$0xff] }
0x14ad   :  { %v1229_v52 = vmul.f32 %v2347_v53, %v1227_v19 }
0x14ae   :  { %1206 = vrot.lane.b32.xlu1 %v1204_v17, %s2377_s2 }
0x14af   :  { %1231 = vrot.lane.b32.xlu0 %v1229_v52, %s2377_s2 }
0x1520   :  { %v1207_v21 = vpop.permute.xlu1 %1206 }
0x1521   :  { %v1209_v23 = vadd.f32 %v1207_v21, %v1199_v20  ;;  %v1232_v24 = vpop.permute.xlu0 %1231 }
0x1522   :  { %v1234_v28 = vadd.f32 %v1232_v24, %v1224_v22 }
0x1523   :  { %2348 = vtanh.f32 %v1209_v23 }
0x1524   :  { %2350 = vtanh.f32 %v1234_v28 }
0x152d   :  { %v2349_v29 = vpop.eup %2348 }
0x152e   :  { %v2351_v33 = vpop.eup %2350  ;;  %1212 = vrot.lane.b32.xlu1 %v2349_v29, %s2377_s2 }
0x152f   :  { %1237 = vrot.lane.b32.xlu0 %v2351_v33, %s2377_s2 }
0x15a0   :  { %v1213_v45 = vpop.permute.xlu1 %1212 }
0x15a1   :  { %v1215_v46 = vmul.f32 %v2345_v16, %v1213_v45  ;;  %v1238_v51 = vpop.permute.xlu0 %1237 }
0x15a2   :  { %v1240_v54 = vmul.f32 %v2347_v53, %v1238_v51 }
0x15a3   :  { %1253 = vrot.lane.b32.xlu1 %v1215_v46, %s2378_s24 }
0x15a4   :  { %1242 = vrot.lane.b32.xlu0 %v1240_v54, %s2379_s25 }
0x1615   :  { %v1254_v1 = vpop.permute.xlu1 %1253 }
0x1616   :  { %v1256_v63 = vsel %vm57_vm0, %v1254_v1, %v2597_v27  ;;  %v1243_v14 = vpop.permute.xlu0 %1242 }
0x1617   :  { %v1273_v3 = vrot.slane %v1256_v63, 2  ;;  %v1245_v12 = vsel %vm57_vm0, %v2595_v26, %v1243_v14  ;;  %v2033_v26 = vld [vmem:[%s3000_s5] ss:$0 sm:$0xff] }
0x1618   :  { %v1276_v31 = vsel %vm1275_vm2, %v1245_v12, %v1258_v2 }
0x1619   :  { %v1278_v58 = vsel %vm1277_vm3, %v1276_v31, %v1261_v0  ;;  %v1283_v27 = vsel %vm1279_vm4, %v1282_v5, %v1273_v3 }
0x161a   :  { %v1280_v4 = vsel %vm1279_vm4, %v1278_v58, %v1264_v48 }
0x161b   :  { %2064 = vmatprep.mubr.msk.f32.mxu1 %vm157_vm1, %v1280_v4 }
0x161c   :  { %2065 = vmatmul.mubr.msk.f32.vlgmr.msra.gmra.mrb[8].mxu1 %vm157_vm1, %v1283_v27 }
0x16ef   :  { %v2066_v6 = vpop.f32.mrb[8].mxu1 }
0x16f0   :  { %v2815_v9 = vadd.f32 %v2066_v6, %v2033_v26  ;;  %v1371_v49 = vpop.f32.mrb[9].mxu1 }
0x16f1   :  { %v2820_v15 = vadd.f32 %v2033_v26, %v1371_v49 }
0x16f2   :  { %1382 = vst.msk [vmem:[%s3004_s9 + $0x8] sm:$0xff] %vm1380_vm5, %v2815_v9 }
0x16f3   :  { %1381 = vst.msk [vmem:[%s3004_s9] sm:$0xff] %vm1380_vm5, %v2820_v15  ;;  %v1393_v50 = vadd.f32 %v2036_v30, %v2820_v15  ;;  %v1450_v18 = vrot.slane %v2820_v15, 3  ;;  %v1449_v25 = vrot.slane %v2820_v15, 2 }
0x16f5   :  { %v1404_v8 = vrot.slane %v1393_v50, %v53_v41  ;;  %v1397_v16 = vrot.slane %v1393_v50, %v2574_v44 }
0x16f7   :  { %1406 = vbcast.lane.b32.xlu0 %v1404_v8, 256  ;;  %1399 = vbcast.lane.b32.xlu1 %v1397_v16, 256 }
0x1769   :  { %v1407_v53 = vpop.permute.xlu0 %1406  ;;  %v1400_v17 = vpop.permute.xlu1 %1399 }
0x176a   :  { %v1409_v19 = vadd.f32 %v1407_v53, %v2839_v47  ;;  %v1408_v52 = vadd.f32 %v1400_v17, %v2839_v47  ;;  %v1510_v17 = vrot.slane %v2820_v15, 5 }
0x176c   :  { %v1417_v20 = vsel %vm1380_vm5, %v1409_v19, -inf  ;;  %v1410_v21 = vsel %vm1380_vm5, %v1408_v52, -inf }
0x176d   :  { %v1418_v41 = vrot.slane %v1417_v20, 4  ;;  %v1411_v22 = vrot.slane %v1410_v21, 4 }
0x176f   :  { %v1419_v23 = vmax.f32 %v1417_v20, %v1418_v41  ;;  %v1412_v24 = vmax.f32 %v1410_v21, %v1411_v22 }
0x1771   :  { %v1420_v28 = vrot.slane %v1419_v23, 2  ;;  %v1413_v32 = vrot.slane %v1412_v24, 2 }
0x1773   :  { %v1421_v35 = vmax.f32 %v1419_v23, %v1420_v28  ;;  %v1414_v36 = vmax.f32 %v1412_v24, %v1413_v32 }
0x1775   :  { %v1422_v37 = vrot.slane %v1421_v35, 1  ;;  %v1415_v13 = vrot.slane %v1414_v36, 1 }
0x1777   :  { %v1423_v42 = vmax.f32 %v1421_v35, %v1422_v37  ;;  %v1416_v7 = vmax.f32 %v1414_v36, %v1415_v13 }
0x1779   :  { %vm1425_vm6 = vcmp.eq.f32.partialorder %v1409_v19, %v1423_v42  ;;  %vm1424_vm7 = vcmp.eq.f32.partialorder %v1408_v52, %v1416_v7  ;;  %v1454_v29 = vadd.f32 %v1450_v18, %v1423_v42  ;;  %v1453_v33 = vadd.f32 %v1449_v25, %v1416_v7 }
0x177a   :  { %v1427_v34 = vsel %vm1425_vm6, %v2565_v40, 8  ;;  %v1426_v38 = vsel %vm1424_vm7, %v2565_v40, 8  ;;  %v1509_v19 = vrot.slane %v2820_v15, 4 }
0x177b   :  { %v1438_v43 = vsel %vm1380_vm5, %v1427_v34, 2147483647  ;;  %v1428_v45 = vsel %vm1380_vm5, %v1426_v38, 2147483647  ;;  %v1465_v46 = vrot.slane %v1454_v29, %v2574_v44  ;;  %v1458_v51 = vrot.slane %v1453_v33, %v2574_v44 }
0x177c   :  { %v1439_v54 = vrot.slane %v1438_v43, 4  ;;  %v1429_v55 = vrot.slane %v1428_v45, 4 }
0x177d   :  { %1467 = vbcast.lane.b32.xlu0 %v1465_v46, 256  ;;  %1460 = vbcast.lane.b32.xlu1 %v1458_v51, 256 }
0x177e   :  { %vm1440_vm8 = vcmp.lt.s32.totalorder %v1438_v43, %v1439_v54  ;;  %vm1430_vm9 = vcmp.lt.s32.totalorder %v1428_v45, %v1429_v55 }
0x177f   :  { %v1441_v56 = vsel %vm1440_vm8, %v1438_v43, %v1439_v54  ;;  %v1431_v59 = vsel %vm1430_vm9, %v1428_v45, %v1429_v55 }
0x1780   :  { %v1442_v60 = vrot.slane %v1441_v56, 2  ;;  %v1432_v61 = vrot.slane %v1431_v59, 2 }
0x1782   :  { %vm1443_vm10 = vcmp.lt.s32.totalorder %v1441_v56, %v1442_v60  ;;  %vm1433_vm11 = vcmp.lt.s32.totalorder %v1431_v59, %v1432_v61 }
0x1783   :  { %v1444_v62 = vsel %vm1443_vm10, %v1441_v56, %v1442_v60  ;;  %v1434_v1 = vsel %vm1433_vm11, %v1431_v59, %v1432_v61 }
0x1784   :  { %v1445_v0 = vrot.slane %v1444_v62, 1  ;;  %v1435_v10 = vrot.slane %v1434_v1, 1 }
0x1786   :  { %vm1436_vm13 = vcmp.lt.s32.totalorder %v1434_v1, %v1435_v10  ;;  %vm1446_vm14 = vcmp.lt.s32.totalorder %v1444_v62, %v1445_v0 }
0x1787   :  { %v1437_v2 = vsel %vm1436_vm13, %v1434_v1, %v1435_v10  ;;  %v1447_v63 = vsel %vm1446_vm14, %v1444_v62, %v1445_v0 }
0x1788   :  { %v2854_v14 = vsel %vm1829_vm12, %v1447_v63, %v1437_v2 }
0x17ef   :  { %v1468_v3 = vpop.permute.xlu0 %1467  ;;  %v1461_v12 = vpop.permute.xlu1 %1460 }
0x17f0   :  { %v1470_v11 = vadd.f32 %v1468_v3, %v2839_v47  ;;  %v1469_v48 = vadd.f32 %v1461_v12, %v2839_v47 }
0x17f2   :  { %v1478_v31 = vsel %vm1380_vm5, %v1470_v11, -inf  ;;  %v1471_v57 = vsel %vm1380_vm5, %v1469_v48, -inf }
0x17f3   :  { %v1479_v58 = vrot.slane %v1478_v31, 4  ;;  %v1472_v4 = vrot.slane %v1471_v57, 4 }
0x17f5   :  { %v1480_v5 = vmax.f32 %v1478_v31, %v1479_v58  ;;  %v1473_v27 = vmax.f32 %v1471_v57, %v1472_v4 }
0x17f7   :  { %v1481_v26 = vrot.slane %v1480_v5, 2  ;;  %v1474_v6 = vrot.slane %v1473_v27, 2 }
0x17f9   :  { %v1482_v49 = vmax.f32 %v1480_v5, %v1481_v26  ;;  %v1475_v30 = vmax.f32 %v1473_v27, %v1474_v6 }
0x17fb   :  { %v1483_v50 = vrot.slane %v1482_v49, 1  ;;  %v1476_v8 = vrot.slane %v1475_v30, 1 }
0x17fd   :  { %v1484_v16 = vmax.f32 %v1482_v49, %v1483_v50  ;;  %v1477_v53 = vmax.f32 %v1475_v30, %v1476_v8 }
0x17ff   :  { %vm1486_vm15 = vcmp.eq.f32.partialorder %v1470_v11, %v1484_v16  ;;  %vm1485_vm0 = vcmp.eq.f32.partialorder %v1469_v48, %v1477_v53  ;;  %v1514_v52 = vadd.f32 %v1510_v17, %v1484_v16  ;;  %v1513_v20 = vadd.f32 %v1509_v19, %v1477_v53 }
0x1800   :  { %v1488_v21 = vsel %vm1486_vm15, %v2565_v40, 8  ;;  %v1487_v41 = vsel %vm1485_vm0, %v2565_v40, 8  ;;  %v1570_v11 = vrot.slane %v2820_v15, 7  ;;  %v1569_v48 = vrot.slane %v2820_v15, 6 }
0x1801   :  { %v1499_v22 = vsel %vm1380_vm5, %v1488_v21, 2147483647  ;;  %v1489_v23 = vsel %vm1380_vm5, %v1487_v41, 2147483647  ;;  %v1525_v24 = vrot.slane %v1514_v52, %v2574_v44  ;;  %v1518_v28 = vrot.slane %v1513_v20, %v2574_v44 }
0x1802   :  { %v1500_v32 = vrot.slane %v1499_v22, 4  ;;  %v1490_v35 = vrot.slane %v1489_v23, 4 }
0x1803   :  { %1527 = vbcast.lane.b32.xlu0 %v1525_v24, 256  ;;  %1520 = vbcast.lane.b32.xlu1 %v1518_v28, 256 }
0x1804   :  { %vm1501_vm1 = vcmp.lt.s32.totalorder %v1499_v22, %v1500_v32  ;;  %vm1491_vm2 = vcmp.lt.s32.totalorder %v1489_v23, %v1490_v35 }
0x1805   :  { %v1502_v36 = vsel %vm1501_vm1, %v1499_v22, %v1500_v32  ;;  %v1492_v37 = vsel %vm1491_vm2, %v1489_v23, %v1490_v35 }
0x1806   :  { %v1503_v13 = vrot.slane %v1502_v36, 2  ;;  %v1493_v42 = vrot.slane %v1492_v37, 2 }
0x1808   :  { %vm1504_vm3 = vcmp.lt.s32.totalorder %v1502_v36, %v1503_v13  ;;  %vm1494_vm4 = vcmp.lt.s32.totalorder %v1492_v37, %v1493_v42 }
0x1809   :  { %v1505_v7 = vsel %vm1504_vm3, %v1502_v36, %v1503_v13  ;;  %v1495_v18 = vsel %vm1494_vm4, %v1492_v37, %v1493_v42 }
0x180a   :  { %v1506_v25 = vrot.slane %v1505_v7, 1  ;;  %v1496_v29 = vrot.slane %v1495_v18, 1 }
0x180c   :  { %vm1497_vm6 = vcmp.lt.s32.totalorder %v1495_v18, %v1496_v29  ;;  %vm1507_vm7 = vcmp.lt.s32.totalorder %v1505_v7, %v1506_v25 }
0x180d   :  { %v1498_v33 = vsel %vm1497_vm6, %v1495_v18, %v1496_v29  ;;  %v1508_v34 = vsel %vm1507_vm7, %v1505_v7, %v1506_v25 }
0x180e   :  { %v2869_v38 = vsel %vm1829_vm12, %v1508_v34, %v1498_v33 }
0x1875   :  { %v1528_v43 = vpop.permute.xlu0 %1527  ;;  %v1521_v45 = vpop.permute.xlu1 %1520 }
0x1876   :  { %v1530_v46 = vadd.f32 %v1528_v43, %v2839_v47  ;;  %v1529_v51 = vadd.f32 %v1521_v45, %v2839_v47 }
0x1878   :  { %v1538_v54 = vsel %vm1380_vm5, %v1530_v46, -inf  ;;  %v1531_v55 = vsel %vm1380_vm5, %v1529_v51, -inf }
0x1879   :  { %v1539_v56 = vrot.slane %v1538_v54, 4  ;;  %v1532_v59 = vrot.slane %v1531_v55, 4 }
0x187b   :  { %v1540_v60 = vmax.f32 %v1538_v54, %v1539_v56  ;;  %v1533_v61 = vmax.f32 %v1531_v55, %v1532_v59 }
0x187d   :  { %v1541_v62 = vrot.slane %v1540_v60, 2  ;;  %v1534_v1 = vrot.slane %v1533_v61, 2 }
0x187f   :  { %v1542_v0 = vmax.f32 %v1540_v60, %v1541_v62  ;;  %v1535_v10 = vmax.f32 %v1533_v61, %v1534_v1 }
0x1881   :  { %v1543_v2 = vrot.slane %v1542_v0, 1  ;;  %v1536_v63 = vrot.slane %v1535_v10, 1 }
0x1883   :  { %v1544_v3 = vmax.f32 %v1542_v0, %v1543_v2  ;;  %v1537_v12 = vmax.f32 %v1535_v10, %v1536_v63 }
0x1885   :  { %vm1546_vm8 = vcmp.eq.f32.partialorder %v1530_v46, %v1544_v3  ;;  %vm1545_vm9 = vcmp.eq.f32.partialorder %v1529_v51, %v1537_v12  ;;  %v1574_v31 = vadd.f32 %v1570_v11, %v1544_v3  ;;  %v1573_v57 = vadd.f32 %v1569_v48, %v1537_v12 }
0x1886   :  { %v1548_v58 = vsel %vm1546_vm8, %v2565_v40, 8  ;;  %v1547_v4 = vsel %vm1545_vm9, %v2565_v40, 8  ;;  %v1630_v46 = vrot.slane %v2815_v9, 1 }
0x1887   :  { %v1559_v5 = vsel %vm1380_vm5, %v1548_v58, 2147483647  ;;  %v1549_v27 = vsel %vm1380_vm5, %v1547_v4, 2147483647  ;;  %v1585_v26 = vrot.slane %v1574_v31, %v2574_v44  ;;  %v1578_v6 = vrot.slane %v1573_v57, %v2574_v44 }
0x1888   :  { %v1560_v49 = vrot.slane %v1559_v5, 4  ;;  %v1550_v30 = vrot.slane %v1549_v27, 4 }
0x1889   :  { %1587 = vbcast.lane.b32.xlu0 %v1585_v26, 256  ;;  %1580 = vbcast.lane.b32.xlu1 %v1578_v6, 256 }
0x188a   :  { %vm1561_vm10 = vcmp.lt.s32.totalorder %v1559_v5, %v1560_v49  ;;  %vm1551_vm11 = vcmp.lt.s32.totalorder %v1549_v27, %v1550_v30 }
0x188b   :  { %v1562_v15 = vsel %vm1561_vm10, %v1559_v5, %v1560_v49  ;;  %v1552_v50 = vsel %vm1551_vm11, %v1549_v27, %v1550_v30 }
0x188c   :  { %v1563_v8 = vrot.slane %v1562_v15, 2  ;;  %v1553_v16 = vrot.slane %v1552_v50, 2 }
0x188e   :  { %vm1564_vm13 = vcmp.lt.s32.totalorder %v1562_v15, %v1563_v8  ;;  %vm1554_vm14 = vcmp.lt.s32.totalorder %v1552_v50, %v1553_v16 }
0x188f   :  { %v1565_v53 = vsel %vm1564_vm13, %v1562_v15, %v1563_v8  ;;  %v1555_v17 = vsel %vm1554_vm14, %v1552_v50, %v1553_v16 }
0x1890   :  { %v1566_v19 = vrot.slane %v1565_v53, 1  ;;  %v1556_v52 = vrot.slane %v1555_v17, 1 }
0x1892   :  { %vm1557_vm15 = vcmp.lt.s32.totalorder %v1555_v17, %v1556_v52  ;;  %vm1567_vm0 = vcmp.lt.s32.totalorder %v1565_v53, %v1566_v19 }
0x1893   :  { %v1558_v20 = vsel %vm1557_vm15, %v1555_v17, %v1556_v52  ;;  %v1568_v21 = vsel %vm1567_vm0, %v1565_v53, %v1566_v19 }
0x1894   :  { %v2884_v41 = vsel %vm1829_vm12, %v1568_v21, %v1558_v20 }
0x18fb   :  { %v1588_v22 = vpop.permute.xlu0 %1587  ;;  %v1581_v23 = vpop.permute.xlu1 %1580 }
0x18fc   :  { %v1590_v24 = vadd.f32 %v1588_v22, %v2839_v47  ;;  %v1589_v28 = vadd.f32 %v1581_v23, %v2839_v47 }
0x18fe   :  { %v1598_v32 = vsel %vm1380_vm5, %v1590_v24, -inf  ;;  %v1591_v35 = vsel %vm1380_vm5, %v1589_v28, -inf }
0x18ff   :  { %v1599_v36 = vrot.slane %v1598_v32, 4  ;;  %v1592_v37 = vrot.slane %v1591_v35, 4 }
0x1901   :  { %v1600_v13 = vmax.f32 %v1598_v32, %v1599_v36  ;;  %v1593_v42 = vmax.f32 %v1591_v35, %v1592_v37 }
0x1903   :  { %v1601_v7 = vrot.slane %v1600_v13, 2  ;;  %v1594_v18 = vrot.slane %v1593_v42, 2 }
0x1905   :  { %v1602_v25 = vmax.f32 %v1600_v13, %v1601_v7  ;;  %v1595_v29 = vmax.f32 %v1593_v42, %v1594_v18 }
0x1907   :  { %v1603_v33 = vrot.slane %v1602_v25, 1  ;;  %v1596_v34 = vrot.slane %v1595_v29, 1 }
0x1909   :  { %v1604_v43 = vmax.f32 %v1602_v25, %v1603_v33  ;;  %v1597_v45 = vmax.f32 %v1595_v29, %v1596_v34 }
0x190b   :  { %vm1606_vm1 = vcmp.eq.f32.partialorder %v1590_v24, %v1604_v43  ;;  %vm1605_vm2 = vcmp.eq.f32.partialorder %v1589_v28, %v1597_v45  ;;  %v1634_v51 = vadd.f32 %v1630_v46, %v1604_v43  ;;  %v1633_v54 = vadd.f32 %v1597_v45, %v2815_v9 }
0x190c   :  { %v1608_v55 = vsel %vm1606_vm1, %v2565_v40, 8  ;;  %v1607_v56 = vsel %vm1605_vm2, %v2565_v40, 8  ;;  %v1690_v24 = vrot.slane %v2815_v9, 3  ;;  %v1689_v28 = vrot.slane %v2815_v9, 2 }
0x190d   :  { %v1619_v59 = vsel %vm1380_vm5, %v1608_v55, 2147483647  ;;  %v1609_v60 = vsel %vm1380_vm5, %v1607_v56, 2147483647  ;;  %v1645_v61 = vrot.slane %v1634_v51, %v2574_v44  ;;  %v1638_v62 = vrot.slane %v1633_v54, %v2574_v44 }
0x190e   :  { %v1620_v1 = vrot.slane %v1619_v59, 4  ;;  %v1610_v0 = vrot.slane %v1609_v60, 4 }
0x190f   :  { %1647 = vbcast.lane.b32.xlu0 %v1645_v61, 256  ;;  %1640 = vbcast.lane.b32.xlu1 %v1638_v62, 256 }
0x1910   :  { %vm1621_vm3 = vcmp.lt.s32.totalorder %v1619_v59, %v1620_v1  ;;  %vm1611_vm4 = vcmp.lt.s32.totalorder %v1609_v60, %v1610_v0 }
0x1911   :  { %v1622_v10 = vsel %vm1621_vm3, %v1619_v59, %v1620_v1  ;;  %v1612_v2 = vsel %vm1611_vm4, %v1609_v60, %v1610_v0 }
0x1912   :  { %v1623_v63 = vrot.slane %v1622_v10, 2  ;;  %v1613_v3 = vrot.slane %v1612_v2, 2 }
0x1914   :  { %vm1624_vm6 = vcmp.lt.s32.totalorder %v1622_v10, %v1623_v63  ;;  %vm1614_vm7 = vcmp.lt.s32.totalorder %v1612_v2, %v1613_v3 }
0x1915   :  { %v1625_v12 = vsel %vm1624_vm6, %v1622_v10, %v1623_v63  ;;  %v1615_v11 = vsel %vm1614_vm7, %v1612_v2, %v1613_v3 }
0x1916   :  { %v1626_v48 = vrot.slane %v1625_v12, 1  ;;  %v1616_v31 = vrot.slane %v1615_v11, 1 }
0x1918   :  { %vm1617_vm8 = vcmp.lt.s32.totalorder %v1615_v11, %v1616_v31  ;;  %vm1627_vm9 = vcmp.lt.s32.totalorder %v1625_v12, %v1626_v48 }
0x1919   :  { %v1618_v57 = vsel %vm1617_vm8, %v1615_v11, %v1616_v31  ;;  %v1628_v58 = vsel %vm1627_vm9, %v1625_v12, %v1626_v48 }
0x191a   :  { %v2899_v4 = vsel %vm1829_vm12, %v1628_v58, %v1618_v57 }
0x1981   :  { %v1648_v5 = vpop.permute.xlu0 %1647  ;;  %v1641_v27 = vpop.permute.xlu1 %1640 }
0x1982   :  { %v1650_v26 = vadd.f32 %v1648_v5, %v2839_v47  ;;  %v1649_v6 = vadd.f32 %v1641_v27, %v2839_v47 }
0x1984   :  { %v1658_v49 = vsel %vm1380_vm5, %v1650_v26, -inf  ;;  %v1651_v30 = vsel %vm1380_vm5, %v1649_v6, -inf }
0x1985   :  { %v1659_v15 = vrot.slane %v1658_v49, 4  ;;  %v1652_v50 = vrot.slane %v1651_v30, 4 }
0x1987   :  { %v1660_v8 = vmax.f32 %v1658_v49, %v1659_v15  ;;  %v1653_v16 = vmax.f32 %v1651_v30, %v1652_v50  ;;  %v1750_v49 = vrot.slane %v2815_v9, 5  ;;  %v1749_v30 = vrot.slane %v2815_v9, 4 }
0x1989   :  { %v1661_v53 = vrot.slane %v1660_v8, 2  ;;  %v1654_v17 = vrot.slane %v1653_v16, 2 }
0x198b   :  { %v1662_v19 = vmax.f32 %v1660_v8, %v1661_v53  ;;  %v1655_v52 = vmax.f32 %v1653_v16, %v1654_v17 }
0x198d   :  { %v1663_v20 = vrot.slane %v1662_v19, 1  ;;  %v1656_v21 = vrot.slane %v1655_v52, 1 }
0x198f   :  { %v1664_v22 = vmax.f32 %v1662_v19, %v1663_v20  ;;  %v1657_v23 = vmax.f32 %v1655_v52, %v1656_v21 }
0x1991   :  { %vm1666_vm10 = vcmp.eq.f32.partialorder %v1650_v26, %v1664_v22  ;;  %vm1665_vm11 = vcmp.eq.f32.partialorder %v1649_v6, %v1657_v23  ;;  %v1694_v32 = vadd.f32 %v1690_v24, %v1664_v22  ;;  %v1693_v35 = vadd.f32 %v1689_v28, %v1657_v23 }
0x1992   :  { %v1668_v36 = vsel %vm1666_vm10, %v2565_v40, 8  ;;  %v1667_v37 = vsel %vm1665_vm11, %v2565_v40, 8 }
0x1993   :  { %v1679_v13 = vsel %vm1380_vm5, %v1668_v36, 2147483647  ;;  %v1669_v42 = vsel %vm1380_vm5, %v1667_v37, 2147483647  ;;  %v1705_v7 = vrot.slane %v1694_v32, %v2574_v44  ;;  %v1698_v18 = vrot.slane %v1693_v35, %v2574_v44 }
0x1994   :  { %v1680_v25 = vrot.slane %v1679_v13, 4  ;;  %v1670_v29 = vrot.slane %v1669_v42, 4 }
0x1995   :  { %1707 = vbcast.lane.b32.xlu0 %v1705_v7, 256  ;;  %1700 = vbcast.lane.b32.xlu1 %v1698_v18, 256 }
0x1996   :  { %vm1681_vm13 = vcmp.lt.s32.totalorder %v1679_v13, %v1680_v25  ;;  %vm1671_vm14 = vcmp.lt.s32.totalorder %v1669_v42, %v1670_v29 }
0x1997   :  { %v1682_v33 = vsel %vm1681_vm13, %v1679_v13, %v1680_v25  ;;  %v1672_v34 = vsel %vm1671_vm14, %v1669_v42, %v1670_v29 }
0x1998   :  { %v1683_v43 = vrot.slane %v1682_v33, 2  ;;  %v1673_v45 = vrot.slane %v1672_v34, 2 }
0x199a   :  { %vm1684_vm15 = vcmp.lt.s32.totalorder %v1682_v33, %v1683_v43  ;;  %vm1674_vm0 = vcmp.lt.s32.totalorder %v1672_v34, %v1673_v45 }
0x199b   :  { %v1685_v46 = vsel %vm1684_vm15, %v1682_v33, %v1683_v43  ;;  %v1675_v51 = vsel %vm1674_vm0, %v1672_v34, %v1673_v45  ;;  %vm1832_vm15 = vcmask 58368  }
0x199c   :  { %v1686_v54 = vrot.slane %v1685_v46, 1  ;;  %v1676_v55 = vrot.slane %v1675_v51, 1 }
0x199e   :  { %vm1677_vm1 = vcmp.lt.s32.totalorder %v1675_v51, %v1676_v55  ;;  %vm1687_vm2 = vcmp.lt.s32.totalorder %v1685_v46, %v1686_v54 }
0x199f   :  { %v1678_v56 = vsel %vm1677_vm1, %v1675_v51, %v1676_v55  ;;  %v1688_v59 = vsel %vm1687_vm2, %v1685_v46, %v1686_v54 }
0x19a0   :  { %v2914_v60 = vsel %vm1829_vm12, %v1688_v59, %v1678_v56 }
0x1a07   :  { %v1708_v61 = vpop.permute.xlu0 %1707  ;;  %v1701_v62 = vpop.permute.xlu1 %1700 }
0x1a08   :  { %v1710_v1 = vadd.f32 %v1708_v61, %v2839_v47  ;;  %v1709_v0 = vadd.f32 %v1701_v62, %v2839_v47 }
0x1a0a   :  { %v1718_v10 = vsel %vm1380_vm5, %v1710_v1, -inf  ;;  %v1711_v2 = vsel %vm1380_vm5, %v1709_v0, -inf }
0x1a0b   :  { %v1719_v63 = vrot.slane %v1718_v10, 4  ;;  %v1712_v3 = vrot.slane %v1711_v2, 4 }
0x1a0d   :  { %v1720_v12 = vmax.f32 %v1718_v10, %v1719_v63  ;;  %v1713_v11 = vmax.f32 %v1711_v2, %v1712_v3  ;;  %v1809_v10 = vrot.slane %v2815_v9, 6  ;;  %v2037_v2 = vld [vmem:[%s3002_s7] ss:$0 sm:$0xff]  ;;  %s2380_s7 = smov [#allocation2]  }
0x1a0e   :  { %s1998_s25 = sshll.u32 %s2380_s7, 4  ;;  %s1999_s25 = int_to_ptr.vmem [resolvable:$true] %s1998_s25 }
0x1a0f   :  { %v1721_v48 = vrot.slane %v1720_v12, 2  ;;  %v1714_v31 = vrot.slane %v1713_v11, 2  ;;  %s2352_s26 = scalar_lea.vmem %s1999_s25, 32  ;;  %p2357_p1 = scmp.lt.s32.totalorder %s1999_s25, %s1999_s25 }
0x1a10   :  { %p2353_p0 = scmp.ne.s32.totalorder %s1999_s25, %s2352_s26  ;;  %p2358_p2 = scmp.lt.s32.totalorder %s2352_s26, %s2352_s26 }
0x1a11   :  { %v1722_v57 = vmax.f32 %v1720_v12, %v1721_v48  ;;  %v1715_v58 = vmax.f32 %v1713_v11, %v1714_v31 }
0x1a12   :  { %p2359_p3 = por %p2358_p2, %p2357_p1 }
0x1a13   :  { %v1723_v5 = vrot.slane %v1722_v57, 1  ;;  %v1716_v27 = vrot.slane %v1715_v58, 1 }
0x1a14   :  { %p2360_p4 = pnand %p2359_p3, %p2353_p0 }
0x1a15   :  { %v1724_v26 = vmax.f32 %v1722_v57, %v1723_v5  ;;  %v1717_v6 = vmax.f32 %v1715_v58, %v1716_v27 }
0x1a17   :  { %vm1726_vm3 = vcmp.eq.f32.partialorder %v1710_v1, %v1724_v26  ;;  %vm1725_vm4 = vcmp.eq.f32.partialorder %v1709_v0, %v1717_v6  ;;  %v1754_v15 = vadd.f32 %v1750_v49, %v1724_v26  ;;  %v1753_v50 = vadd.f32 %v1749_v30, %v1717_v6 }
0x1a18   :  { %v1728_v8 = vsel %vm1726_vm3, %v2565_v40, 8  ;;  %v1727_v16 = vsel %vm1725_vm4, %v2565_v40, 8  ;;  %v1810_v1 = vrot.slane %v2815_v9, 7 }
0x1a19   :  { %v1739_v53 = vsel %vm1380_vm5, %v1728_v8, 2147483647  ;;  %v1729_v17 = vsel %vm1380_vm5, %v1727_v16, 2147483647  ;;  %v1765_v19 = vrot.slane %v1754_v15, %v2574_v44  ;;  %v1758_v52 = vrot.slane %v1753_v50, %v2574_v44 }
0x1a1a   :  { %v1740_v20 = vrot.slane %v1739_v53, 4  ;;  %v1730_v21 = vrot.slane %v1729_v17, 4 }
0x1a1b   :  { %1767 = vbcast.lane.b32.xlu0 %v1765_v19, 256  ;;  %1760 = vbcast.lane.b32.xlu1 %v1758_v52, 256 }
0x1a1c   :  { %vm1741_vm6 = vcmp.lt.s32.totalorder %v1739_v53, %v1740_v20  ;;  %vm1731_vm7 = vcmp.lt.s32.totalorder %v1729_v17, %v1730_v21 }
0x1a1d   :  { %v1742_v22 = vsel %vm1741_vm6, %v1739_v53, %v1740_v20  ;;  %v1732_v23 = vsel %vm1731_vm7, %v1729_v17, %v1730_v21 }
0x1a1e   :  { %v1743_v24 = vrot.slane %v1742_v22, 2  ;;  %v1733_v28 = vrot.slane %v1732_v23, 2 }
0x1a20   :  { %vm1744_vm8 = vcmp.lt.s32.totalorder %v1742_v22, %v1743_v24  ;;  %vm1734_vm9 = vcmp.lt.s32.totalorder %v1732_v23, %v1733_v28 }
0x1a21   :  { %v1745_v32 = vsel %vm1744_vm8, %v1742_v22, %v1743_v24  ;;  %v1735_v35 = vsel %vm1734_vm9, %v1732_v23, %v1733_v28  ;;  %v2948_v22 = vand.u32 127, %v47_v39 }
0x1a22   :  { %v1746_v36 = vrot.slane %v1745_v32, 1  ;;  %v1736_v37 = vrot.slane %v1735_v35, 1 }
0x1a24   :  { %vm1737_vm10 = vcmp.lt.s32.totalorder %v1735_v35, %v1736_v37  ;;  %vm1747_vm11 = vcmp.lt.s32.totalorder %v1745_v32, %v1746_v36 }
0x1a25   :  { %v1738_v13 = vsel %vm1737_vm10, %v1735_v35, %v1736_v37  ;;  %v1748_v44 = vsel %vm1747_vm11, %v1745_v32, %v1746_v36  ;;  %vm1879_vm10 = vcmp.eq.s32.totalorder %v2948_v22, 6 }
0x1a26   :  { %v2929_v42 = vsel %vm1829_vm12, %v1748_v44, %v1738_v13 }
0x1a8d   :  { %v1768_v7 = vpop.permute.xlu0 %1767  ;;  %v1761_v18 = vpop.permute.xlu1 %1760 }
0x1a8e   :  { %v1770_v25 = vadd.f32 %v1768_v7, %v2839_v47  ;;  %v1769_v29 = vadd.f32 %v1761_v18, %v2839_v47 }
0x1a90   :  { %v1778_v33 = vsel %vm1380_vm5, %v1770_v25, -inf  ;;  %v1771_v34 = vsel %vm1380_vm5, %v1769_v29, -inf }
0x1a91   :  { %v1779_v43 = vrot.slane %v1778_v33, 4  ;;  %v1772_v45 = vrot.slane %v1771_v34, 4 }
0x1a93   :  { %v1780_v46 = vmax.f32 %v1778_v33, %v1779_v43  ;;  %v1773_v51 = vmax.f32 %v1771_v34, %v1772_v45 }
0x1a95   :  { %v1781_v54 = vrot.slane %v1780_v46, 2  ;;  %v1774_v55 = vrot.slane %v1773_v51, 2 }
0x1a97   :  { %v1782_v56 = vmax.f32 %v1780_v46, %v1781_v54  ;;  %v1775_v59 = vmax.f32 %v1773_v51, %v1774_v55 }
0x1a99   :  { %v1783_v61 = vrot.slane %v1782_v56, 1  ;;  %v1776_v62 = vrot.slane %v1775_v59, 1 }
0x1a9b   :  { %v1784_v0 = vmax.f32 %v1782_v56, %v1783_v61  ;;  %v1777_v47 = vmax.f32 %v1775_v59, %v1776_v62 }
0x1a9d   :  { %vm1786_vm13 = vcmp.eq.f32.partialorder %v1770_v25, %v1784_v0  ;;  %v1814_v63 = vadd.f32 %v1810_v1, %v1784_v0  ;;  %vm1785_vm14 = vcmp.eq.f32.partialorder %v1769_v29, %v1777_v47  ;;  %v1813_v3 = vadd.f32 %v1809_v10, %v1777_v47 }
0x1a9e   :  { %v1788_v12 = vsel %vm1786_vm13, %v2565_v40, 8  ;;  %v1787_v11 = vsel %vm1785_vm14, %v2565_v40, 8  ;;  %vm1897_vm13 = vcmp.eq.s32.totalorder %v2948_v22, 5 }
0x1a9f   :  { %v1799_v48 = vsel %vm1380_vm5, %v1788_v12, 2147483647  ;;  %v1789_v31 = vsel %vm1380_vm5, %v1787_v11, 2147483647  ;;  %v1823_v57 = vadd.f32 %v2037_v2, %v1814_v63  ;;  %v1822_v5 = vadd.f32 %v2037_v2, %v1813_v3 }
0x1aa0   :  { %v1800_v58 = vrot.slane %v1799_v48, 4  ;;  %v1790_v9 = vrot.slane %v1789_v31, 4 }
0x1aa1   :  { %v1828_v27 = vrot.slane %v1823_v57, 7 }
0x1aa2   :  { %vm1801_vm0 = vcmp.lt.s32.totalorder %v1799_v48, %v1800_v58  ;;  %vm1791_vm1 = vcmp.lt.s32.totalorder %v1789_v31, %v1790_v9 }
0x1aa3   :  { %v1802_v26 = vsel %vm1801_vm0, %v1799_v48, %v1800_v58  ;;  %v1792_v6 = vsel %vm1791_vm1, %v1789_v31, %v1790_v9  ;;  %v1830_v49 = vsel %vm1829_vm12, %v1828_v27, %v1822_v5  ;;  %vm1915_vm0 = vcmp.eq.s32.totalorder %v2948_v22, 4 }
0x1aa4   :  { %v1803_v30 = vrot.slane %v1802_v26, 2  ;;  %v1793_v15 = vrot.slane %v1792_v6, 2  ;;  %v1833_v40 = vsel %vm1832_vm15, %v1830_v49, -inf }
0x1aa5   :  { %1834 = vmax.xlane.f32.xlu0 %v1833_v40 }
0x1aa6   :  { %vm1804_vm2 = vcmp.lt.s32.totalorder %v1802_v26, %v1803_v30  ;;  %vm1794_vm3 = vcmp.lt.s32.totalorder %v1792_v6, %v1793_v15 }
0x1aa7   :  { %v1805_v50 = vsel %vm1804_vm2, %v1802_v26, %v1803_v30  ;;  %v1795_v8 = vsel %vm1794_vm3, %v1792_v6, %v1793_v15  ;;  %vm1933_vm2 = vcmp.eq.s32.totalorder %v2948_v22, 3 }
0x1aa8   :  { %v1806_v16 = vrot.slane %v1805_v50, 1  ;;  %v1796_v53 = vrot.slane %v1795_v8, 1 }
0x1aaa   :  { %vm1797_vm5 = vcmp.lt.s32.totalorder %v1795_v8, %v1796_v53  ;;  %vm1807_vm4 = vcmp.lt.s32.totalorder %v1805_v50, %v1806_v16 }
0x1aab   :  { %v1798_v17 = vsel %vm1797_vm5, %v1795_v8, %v1796_v53  ;;  %v1808_v19 = vsel %vm1807_vm4, %v1805_v50, %v1806_v16  ;;  %vm1951_vm5 = vcmp.eq.s32.totalorder %v2948_v22, 2 }
0x1aac   :  { %v1864_v52 = vsel %vm1829_vm12, %v1808_v19, %v1798_v17 }
0x1b32   :  { %v1835_v20 = vpop.xlane.xlu0 %1834 }
0x1b33   :  { %v1837_v21 = vrot.slane %v1835_v20, 1  ;;  %vm1840_vm6 = vcmp.eq.f32.partialorder %v1822_v5, %v1835_v20 }
0x1b34   :  { %v1842_v28 = vsel %vm1840_vm6, %v2948_v22, 8  ;;  %vm1969_vm6 = vcmp.eq.s32.totalorder %v2948_v22, 1 }
0x1b35   :  { %vm1841_vm7 = vcmp.eq.f32.partialorder %v1823_v57, %v1837_v21 }
0x1b36   :  { %v1843_v23 = vsel %vm1841_vm7, %v2948_v22, 8 }
0x1b37   :  { %v1844_v24 = vrot.slane %v1843_v23, 7 }
0x1b39   :  { %v1845_v32 = vsel %vm1829_vm12, %v1844_v24, %v1842_v28  ;;  %vm1861_vm12 = vcmp.eq.s32.totalorder %v2948_v22, 7 }
0x1b3a   :  { %v1846_v35 = vsel %vm1832_vm15, %v1845_v32, 2147483647 }
0x1b3b   :  { %v1848_v36 = vshra.s32 %v1846_v35, 16  ;;  %v1847_v13 = vand.u32 65535, %v1846_v35 }
0x1b3d   :  { %v1850_v37 = vcvt.s32.f32 %v1848_v36  ;;  %v1849_v7 = vcvt.s32.f32 %v1847_v13 }
0x1b3f   :  { %1851 = vmin.xlane.f32.xlu1 %v1850_v37 }
0x1bcc   :  { %v1852_v44 = vpop.xlane.xlu1 %1851 }
0x1bcd   :  { %vm1853_vm8 = vcmp.eq.f32.partialorder %v1850_v37, %v1852_v44  ;;  %v1858_v18 = vcvt.f32.s32 %v1852_v44 }
0x1bce   :  { %v1854_v39 = vsel %vm1853_vm8, %v1849_v7, inf  ;;  %vm1987_vm8 = vcmp.eq.s32.totalorder %v2948_v22, 0 }
0x1bcf   :  { %1855 = vmin.xlane.f32.xlu0 %v1854_v39  ;;  %v1859_v29 = vshll.u32 %v1858_v18, 16 }
0x1c5c   :  { %v1856_v25 = vpop.xlane.xlu0 %1855 }
0x1c5d   :  { %v1857_v33 = vcvt.f32.s32 %v1856_v25 }
0x1c5f   :  { %v1860_v34 = vadd.s32 %v1859_v29, %v1857_v33 }
0x1c61   :  { %vm1863_vm9 = vcmp.eq.s32.totalorder %v2948_v22, %v1860_v34  ;;  %v1862_v10 = vsel %vm1861_vm12, %v1860_v34, 0 }
0x1c62   :  { %v1865_v43 = vsel %vm1863_vm9, %v1864_v52, 0 }
0x1c63   :  { %v1866_v45 = vsel %vm1832_vm15, %v1865_v43, 0 }
0x1c64   :  { %v1868_v46 = vshrl.u32 %v1866_v45, 16  ;;  %v1867_v51 = vand.u32 65535, %v1866_v45 }
0x1c66   :  { %v1870_v54 = vcvt.s32.f32 %v1868_v46  ;;  %v1869_v55 = vcvt.s32.f32 %v1867_v51 }
0x1c68   :  { %1873 = vadd.xlane.f32.xlu0 %v1870_v54  ;;  %1871 = vadd.xlane.f32.xlu1 %v1869_v55 }
0x1cf5   :  { %v1874_v56 = vpop.xlane.xlu0 %1873  ;;  %v1872_v59 = vpop.xlane.xlu1 %1871 }
0x1cf6   :  { %v1876_v61 = vcvt.f32.s32 %v1874_v56  ;;  %v1875_v1 = vcvt.f32.s32 %v1872_v59 }
0x1cf8   :  { %v1877_v62 = vshll.u32 %v1876_v61, 16 }
0x1cfa   :  { %v1878_v0 = vadd.s32 %v1877_v62, %v1875_v1 }
0x1cfc   :  { %v1880_v47 = vsel %vm1879_vm10, %v1878_v0, %v1862_v10  ;;  %vm1881_vm11 = vcmp.eq.s32.totalorder %v2948_v22, %v1878_v0 }
0x1cfd   :  { %v1883_v2 = vsel %vm1881_vm11, %v2929_v42, 0 }
0x1cfe   :  { %v1884_v63 = vsel %vm1832_vm15, %v1883_v2, 0 }
0x1cff   :  { %v1886_v3 = vshrl.u32 %v1884_v63, 16  ;;  %v1885_v12 = vand.u32 65535, %v1884_v63 }
0x1d01   :  { %v1888_v11 = vcvt.s32.f32 %v1886_v3  ;;  %v1887_v48 = vcvt.s32.f32 %v1885_v12 }
0x1d03   :  { %1891 = vadd.xlane.f32.xlu0 %v1888_v11  ;;  %1889 = vadd.xlane.f32.xlu1 %v1887_v48 }
0x1d90   :  { %v1892_v31 = vpop.xlane.xlu0 %1891  ;;  %v1890_v57 = vpop.xlane.xlu1 %1889 }
0x1d91   :  { %v1894_v58 = vcvt.f32.s32 %v1892_v31  ;;  %v1893_v5 = vcvt.f32.s32 %v1890_v57 }
0x1d93   :  { %v1895_v9 = vshll.u32 %v1894_v58, 16 }
0x1d95   :  { %v1896_v27 = vadd.s32 %v1895_v9, %v1893_v5 }
0x1d97   :  { %v1898_v26 = vsel %vm1897_vm13, %v1896_v27, %v1880_v47  ;;  %vm1899_vm14 = vcmp.eq.s32.totalorder %v2948_v22, %v1896_v27 }
0x1d98   :  { %v1901_v42 = vsel %vm1899_vm14, %v2914_v60, 0 }
0x1d99   :  { %v1902_v6 = vsel %vm1832_vm15, %v1901_v42, 0 }
0x1d9a   :  { %v1904_v49 = vshrl.u32 %v1902_v6, 16  ;;  %v1903_v30 = vand.u32 65535, %v1902_v6 }
0x1d9c   :  { %v1906_v15 = vcvt.s32.f32 %v1904_v49  ;;  %v1905_v40 = vcvt.s32.f32 %v1903_v30 }
0x1d9e   :  { %1909 = vadd.xlane.f32.xlu0 %v1906_v15  ;;  %1907 = vadd.xlane.f32.xlu1 %v1905_v40 }
0x1e2b   :  { %v1910_v50 = vpop.xlane.xlu0 %1909  ;;  %v1908_v8 = vpop.xlane.xlu1 %1907 }
0x1e2c   :  { %v1912_v16 = vcvt.f32.s32 %v1910_v50  ;;  %v1911_v17 = vcvt.f32.s32 %v1908_v8 }
0x1e2e   :  { %v1913_v53 = vshll.u32 %v1912_v16, 16 }
0x1e30   :  { %v1914_v19 = vadd.s32 %v1913_v53, %v1911_v17 }
0x1e32   :  { %v1916_v52 = vsel %vm1915_vm0, %v1914_v19, %v1898_v26  ;;  %vm1917_vm1 = vcmp.eq.s32.totalorder %v2948_v22, %v1914_v19 }
0x1e33   :  { %v1919_v60 = vsel %vm1917_vm1, %v2899_v4, 0 }
0x1e34   :  { %v1920_v20 = vsel %vm1832_vm15, %v1919_v60, 0 }
0x1e35   :  { %v1922_v21 = vshrl.u32 %v1920_v20, 16  ;;  %v1921_v23 = vand.u32 65535, %v1920_v20 }
0x1e37   :  { %v1924_v24 = vcvt.s32.f32 %v1922_v21  ;;  %v1923_v28 = vcvt.s32.f32 %v1921_v23 }
0x1e39   :  { %1927 = vadd.xlane.f32.xlu0 %v1924_v24  ;;  %1925 = vadd.xlane.f32.xlu1 %v1923_v28 }
0x1ec6   :  { %v1928_v32 = vpop.xlane.xlu0 %1927  ;;  %v1926_v35 = vpop.xlane.xlu1 %1925 }
0x1ec7   :  { %v1930_v36 = vcvt.f32.s32 %v1928_v32  ;;  %v1929_v13 = vcvt.f32.s32 %v1926_v35 }
0x1ec9   :  { %v1931_v37 = vshll.u32 %v1930_v36, 16 }
0x1ecb   :  { %v1932_v44 = vadd.s32 %v1931_v37, %v1929_v13 }
0x1ecd   :  { %v1934_v7 = vsel %vm1933_vm2, %v1932_v44, %v1916_v52  ;;  %vm1935_vm3 = vcmp.eq.s32.totalorder %v2948_v22, %v1932_v44 }
0x1ece   :  { %v1937_v4 = vsel %vm1935_vm3, %v2884_v41, 0 }
0x1ecf   :  { %v1938_v39 = vsel %vm1832_vm15, %v1937_v4, 0 }
0x1ed0   :  { %v1940_v18 = vshrl.u32 %v1938_v39, 16  ;;  %v1939_v25 = vand.u32 65535, %v1938_v39 }
0x1ed2   :  { %v1942_v29 = vcvt.s32.f32 %v1940_v18  ;;  %v1941_v33 = vcvt.s32.f32 %v1939_v25 }
0x1ed4   :  { %1945 = vadd.xlane.f32.xlu0 %v1942_v29  ;;  %1943 = vadd.xlane.f32.xlu1 %v1941_v33 }
0x1f61   :  { %v1946_v34 = vpop.xlane.xlu0 %1945  ;;  %v1944_v43 = vpop.xlane.xlu1 %1943 }
0x1f62   :  { %v1948_v45 = vcvt.f32.s32 %v1946_v34  ;;  %v1947_v51 = vcvt.f32.s32 %v1944_v43 }
0x1f64   :  { %v1949_v46 = vshll.u32 %v1948_v45, 16 }
0x1f66   :  { %v1950_v54 = vadd.s32 %v1949_v46, %v1947_v51 }
0x1f68   :  { %v1952_v55 = vsel %vm1951_vm5, %v1950_v54, %v1934_v7  ;;  %vm1953_vm4 = vcmp.eq.s32.totalorder %v2948_v22, %v1950_v54 }
0x1f69   :  { %v1955_v41 = vsel %vm1953_vm4, %v2869_v38, 0 }
0x1f6a   :  { %v1956_v56 = vsel %vm1832_vm15, %v1955_v41, 0 }
0x1f6b   :  { %v1958_v59 = vshrl.u32 %v1956_v56, 16  ;;  %v1957_v61 = vand.u32 65535, %v1956_v56 }
0x1f6d   :  { %v1960_v62 = vcvt.s32.f32 %v1958_v59  ;;  %v1959_v1 = vcvt.s32.f32 %v1957_v61 }
0x1f6f   :  { %1963 = vadd.xlane.f32.xlu0 %v1960_v62  ;;  %1961 = vadd.xlane.f32.xlu1 %v1959_v1 }
0x1ffc   :  { %v1964_v0 = vpop.xlane.xlu0 %1963  ;;  %v1962_v10 = vpop.xlane.xlu1 %1961 }
0x1ffd   :  { %v1966_v47 = vcvt.f32.s32 %v1964_v0  ;;  %v1965_v63 = vcvt.f32.s32 %v1962_v10 }
0x1fff   :  { %v1967_v2 = vshll.u32 %v1966_v47, 16 }
0x2001   :  { %v1968_v3 = vadd.s32 %v1967_v2, %v1965_v63 }
0x2003   :  { %vm1971_vm7 = vcmp.eq.s32.totalorder %v2948_v22, %v1968_v3  ;;  %v1970_v12 = vsel %vm1969_vm6, %v1968_v3, %v1952_v55 }
0x2004   :  { %v1973_v38 = vsel %vm1971_vm7, %v2854_v14, 0 }
0x2005   :  { %v1974_v11 = vsel %vm1832_vm15, %v1973_v38, 0 }
0x2006   :  { %v1976_v48 = vshrl.u32 %v1974_v11, 16  ;;  %v1975_v31 = vand.u32 65535, %v1974_v11 }
0x2008   :  { %v1978_v57 = vcvt.s32.f32 %v1976_v48  ;;  %v1977_v58 = vcvt.s32.f32 %v1975_v31 }
0x200a   :  { %1981 = vadd.xlane.f32.xlu0 %v1978_v57  ;;  %1979 = vadd.xlane.f32.xlu1 %v1977_v58 }
0x2097   :  { %v1982_v9 = vpop.xlane.xlu0 %1981  ;;  %v1980_v5 = vpop.xlane.xlu1 %1979 }
0x2098   :  { %v1984_v27 = vcvt.f32.s32 %v1982_v9  ;;  %v1983_v42 = vcvt.f32.s32 %v1980_v5 }
0x209a   :  { %v1985_v26 = vshll.u32 %v1984_v27, 16 }
0x209c   :  { %v1986_v6 = vadd.s32 %v1985_v26, %v1983_v42 }
0x209e   :  { %v1988_v14 = vsel %vm1987_vm8, %v1986_v6, %v1970_v12 }
0x209f   :  { %1989 = vst.msk [vmem:[#allocation2] sm:$0x3] %vm1832_vm15, %v1988_v14 }
0x20a0   :  { %2363 = shalt.err (!%p2360_p4)
}
0x20a1   :  { %s2364_s28 = scalar_lea.hbm %s3005_s10, 32 }
0x20a2   :  { %p2365_p5 = scmp.ne.s32.totalorder %s3005_s10, %s2364_s28  ;;  %p2368_p6 = scmp.lt.u32.totalorder %s2364_s28, %s3005_s10 }
0x20a4   :  { %p2370_p7 = pnand %p2368_p6, %p2365_p5 }
0x20a6   :  { %2373 = shalt.err (!%p2370_p7)
}
0x20a7   :  { %2001 = dma.vmem_to_hbm [thread:$0]  %s1999_s25, 32, %s3005_s10, [#allocation3]  }
0x20a8   :  { %2374 = dma.done.wait [#allocation3], 32  }
0x20a9   :  { %2375 = vsyncadd [#allocation3], 4294967264 }
0x20aa   :  { %2007 = vsyncpa [#allocation3], 1 }

</bundles_post_ra>
